<compile_context>
chip_gen: v6e
topology: v6e:2x2x1
jax: 0.10.0
libtpu: 0.0.40
codegen_flags: <defaults>
</compile_context>

<pallas_src>
import functools

import jax
import jax.numpy as jnp
from jax.experimental import pallas as pl
from jax.experimental.pallas import tpu as pltpu


def _round_up(x, m):
    return (x + m - 1) // m * m


def _audio_encoder_kernel(x_ref, w1a_ref, w1b_ref, s1_ref, b1_ref,
                          w2_ref, s2_ref, b2_ref, wp_ref, bp_ref,
                          out_ref, xhalo_ref, phalo_ref, acc_ref, *, t2_valid):
    bt, tcq, _ = x_ref.shape          # (batch tile, packed rows, 4*64)
    t = pl.program_id(1)
    nt = pl.num_programs(1)

    @pl.when(t == 0)
    def _init():                      # only the tiny halos + acc are zeroed
        acc_ref[...] = jnp.zeros_like(acc_ref)
        xhalo_ref[...] = jnp.zeros_like(xhalo_ref)
        phalo_ref[...] = jnp.zeros_like(phalo_ref)

    xq = x_ref[...]                                              # (bt, tcq, 256) bf16
    # Previous packed row's lanes 128:256 = input taps x[2m], x[2m+1] (2-row halo).
    prev = jnp.concatenate([xhalo_ref[...], xq[:, :tcq - 1, 128:256]], axis=1)
    xhalo_ref[...] = xq[:, tcq - 1:tcq, 128:256]                 # carry for next chunk

    # ---- Conv1d(64->64,k=3) + folded BN + ReLU: 4 outputs/row, split-K MXU matmuls ----
    h1 = (jnp.dot(xq.reshape(bt * tcq, 256), w1b_ref[...],
                  preferred_element_type=jnp.float32)
          + jnp.dot(prev.reshape(bt * tcq, 128), w1a_ref[...],
                    preferred_element_type=jnp.float32))
    h1 = jnp.maximum(h1 * s1_ref[...] + b1_ref[...], 0.0)        # (bt*tcq, 256) f32

    # ---- MaxPool1d(2,2): cols ordered [h1[2m],h1[2m+2] | h1[2m+1],h1[2m+3]] ----
    pq = jnp.maximum(h1[:, 0:128], h1[:, 128:256]).astype(jnp.bfloat16)
    pq3 = pq.reshape(bt, tcq, 128)                               # [pooled[2g-1] | pooled[2g]]

    prev_p = jnp.concatenate([phalo_ref[...], pq3[:, :tcq - 1, :]], axis=1)
    phalo_ref[...] = pq3[:, tcq - 1:tcq, :]                      # carry for next chunk

    # ---- Conv1d(64->128,k=3) + folded BN + ReLU: 2 outputs/row, full 256x256 MXU tile ----
    yi2 = jnp.concatenate([prev_p, pq3], axis=-1).reshape(bt * tcq, 256)
    h2 = jnp.dot(yi2, w2_ref[...], preferred_element_type=jnp.float32)
    h2 = jnp.maximum(h2 * s2_ref[...] + b2_ref[...], 0.0).reshape(bt, tcq, 256)
    h2a = h2[:, :, 0:128]        # h2 at global index j0 = 2*(t*tcq + r) - 3
    h2b = h2[:, :, 128:256]      # h2 at global index j0 + 1

    # ---- AdaptiveAvgPool1d(1): streamed time-sum; mask only on edge chunks ----
    is_edge = jnp.logical_or(t == 0, t == nt - 1)

    @pl.when(is_edge)
    def _acc_edge():
        r = jax.lax.broadcasted_iota(jnp.int32, (1, tcq, 1), 1)
        j0 = 2 * (t * tcq + r) - 3
        va = jnp.logical_and(j0 >= 0, j0 < t2_valid)
        vb = jnp.logical_and(j0 + 1 >= 0, j0 + 1 < t2_valid)
        acc_ref[...] += jnp.sum(jnp.where(va, h2a, 0.0) + jnp.where(vb, h2b, 0.0), axis=1)

    @pl.when(jnp.logical_not(is_edge))
    def _acc_mid():
        acc_ref[...] += jnp.sum(h2a + h2b, axis=1)

    @pl.when(t == nt - 1)
    def _finalize():
        feat = acc_ref[...] * (1.0 / t2_valid)                   # mean over valid time steps
        proj = jnp.dot(feat, wp_ref[...], preferred_element_type=jnp.float32) + bp_ref[...]
        out_ref[...] = jnp.maximum(proj, 0.0)                    # Dropout(0.2) = identity (eval)


def audio_encoder(x_nchw, params, *, b_tile=8, t_chunk=2048):
    """x_nchw: (B, 1, 64, T) float32 — matches the PyTorch forward's expected input."""
    (w1, b1, g1, be1, rm1, rv1,
     w2, b2, g2, be2, rm2, rv2,
     wp, bp) = params
    eps = 1e-5

    B = x_nchw.shape[0]
    T = x_nchw.shape[-1]
    assert x_nchw.shape[1] == 1 and x_nchw.shape[2] == 64
    T1 = T - 2
    Tp = T1 // 2
    T2 = Tp - 2
    assert T2 >= 1, "sequence too short for conv->pool->conv"

    # Fold BatchNorm (eval mode) into per-channel scale/shift (conv bias folded in too).
    s1 = g1 / jnp.sqrt(rv1 + eps)
    b1e = (b1 - rm1) * s1 + be1
    s2 = g2 / jnp.sqrt(rv2 + eps)
    b2e = (b2 - rm2) * s2 + be2

    # Conv1 weight, output-quad packed: rows = 6 input taps x[2m..2m+5] (64ch each),
    # cols = [h1[2m] | h1[2m+2] | h1[2m+1] | h1[2m+3]]  (so pool = max of the 128-lane halves).
    w1k = jnp.transpose(w1, (2, 1, 0))                           # (3, in, out)
    w1q = jnp.zeros((6, 64, 4, 64), jnp.float32)
    for c, off in enumerate((0, 2, 1, 3)):
        for k in range(3):
            w1q = w1q.at[off + k, :, c, :].set(w1k[k])
    w1q = w1q.reshape(384, 256).astype(jnp.bfloat16)
    w1a, w1b = w1q[:128], w1q[128:]                              # taps {0,1} (halo) / {2..5}

    # Conv2 weight, output-pair packed: rows = 4 pooled taps, cols = [h2[m0] | h2[m0+1]].
    w2k = jnp.transpose(w2, (2, 1, 0))                           # (3, 64, 128)
    w2q = jnp.zeros((4, 64, 2, 128), jnp.float32)
    for k in range(3):
        w2q = w2q.at[k, :, 0, :].set(w2k[k])
        w2q = w2q.at[k + 1, :, 1, :].set(w2k[k])
    w2q = w2q.reshape(256, 256).astype(jnp.bfloat16)

    s1q = jnp.tile(s1, 4).reshape(1, 256).astype(jnp.float32)
    b1q = jnp.tile(b1e, 4).reshape(1, 256).astype(jnp.float32)
    s2q = jnp.tile(s2, 2).reshape(1, 256).astype(jnp.float32)
    b2q = jnp.tile(b2e, 2).reshape(1, 256).astype(jnp.float32)
    wpi = wp.T.astype(jnp.float32)                               # (128, 128) f32 epilogue
    bpi = bp.reshape(1, 128).astype(jnp.float32)

    # Chunk size in packed rows (4 input steps each); multiple of 8 sublanes.
    Tq = -(-T // 4)
    tcq = max(8, min(_round_up(t_chunk, 32) // 4, _round_up(Tq, 8)))
    Tq_pad = _round_up(Tq, tcq)
    B_pad = _round_up(B, b_tile)
    n_bt = B_pad // b_tile
    n_ch = Tq_pad // tcq

    # Single fused pad+cast+transpose+pack producer: (B,1,64,T) f32 -> (B_pad,Tq_pad,256) bf16.
    xq = jnp.pad(x_nchw[:, 0].astype(jnp.bfloat16),
                 ((0, B_pad - B), (0, 0), (0, 4 * Tq_pad - T)))
    xq = xq.transpose(0, 2, 1).reshape(B_pad, Tq_pad, 256)

    flops = 2 * B_pad * Tq_pad * (384 * 256 + 256 * 256) + 2 * B_pad * 128 * 128
    bytes_accessed = int(xq.size * 2 + w1q.size * 2 + w2q.size * 2
                         + wpi.size * 4 + B_pad * 128 * 4)

    kernel = functools.partial(_audio_encoder_kernel, t2_valid=T2)
    out = pl.pallas_call(
        kernel,
        out_shape=jax.ShapeDtypeStruct((B_pad, 128), jnp.float32),
        grid_spec=pltpu.PrefetchScalarGridSpec(
            num_scalar_prefetch=0,
            grid=(n_bt, n_ch),
            in_specs=[
                pl.BlockSpec((b_tile, tcq, 256), lambda i, t: (i, t, 0)),  # packed input
                pl.BlockSpec((128, 256), lambda i, t: (0, 0)),             # conv1 W (halo taps)
                pl.BlockSpec((256, 256), lambda i, t: (0, 0)),             # conv1 W (main taps)
                pl.BlockSpec((1, 256), lambda i, t: (0, 0)),               # BN1 scale (x4)
                pl.BlockSpec((1, 256), lambda i, t: (0, 0)),               # BN1 shift (+bias)
                pl.BlockSpec((256, 256), lambda i, t: (0, 0)),             # conv2 W (paired)
                pl.BlockSpec((1, 256), lambda i, t: (0, 0)),               # BN2 scale (x2)
                pl.BlockSpec((1, 256), lambda i, t: (0, 0)),               # BN2 shift (+bias)
                pl.BlockSpec((128, 128), lambda i, t: (0, 0)),             # projection weight
                pl.BlockSpec((1, 128), lambda i, t: (0, 0)),               # projection bias
            ],
            out_specs=pl.BlockSpec((b_tile, 128), lambda i, t: (i, 0)),
            scratch_shapes=[
                pltpu.VMEM((b_tile, 1, 128), jnp.bfloat16),   # packed 2-input-row halo
                pltpu.VMEM((b_tile, 1, 128), jnp.bfloat16),   # packed 2-pooled-row halo
                pltpu.VMEM((b_tile, 128), jnp.float32),       # streamed time-sum
            ],
        ),
        compiler_params=pltpu.CompilerParams(
            dimension_semantics=("parallel", "arbitrary"),
            vmem_limit_bytes=48 * 1024 * 1024,                 # headroom on v7x's 64 MiB VMEM
        ),
        cost_estimate=pl.CostEstimate(flops=flops, transcendentals=0,
                                      bytes_accessed=bytes_accessed),
    )(xq, w1a, w1b, s1q, b1q, w2q, s2q, b2q, wpi, bpi)
    return out[:B]


def reference(x_nchw, params):
    """Pure-JAX (f32) reference of the same eval-mode forward pass."""
    (w1, b1, g1, be1, rm1, rv1,
     w2, b2, g2, be2, rm2, rv2,
     wp, bp) = params
    eps = 1e-5
    x = jnp.squeeze(x_nchw, axis=1)                    # (B, 64, T)

    def conv1d(x, w, b):                               # x:(B,Ci,T) w:(Co,Ci,k)
        y = jax.lax.conv_general_dilated(x, w, (1,), 'VALID',
                                         dimension_numbers=('NCH', 'OIH', 'NCH'))
        return y + b[None, :, None]

    h = conv1d(x, w1, b1)
    h = (h - rm1[None, :, None]) / jnp.sqrt(rv1[None, :, None] + eps) \
        * g1[None, :, None] + be1[None, :, None]
    h = jnp.maximum(h, 0.0)
    B, C, L = h.shape
    h = jnp.max(h[:, :, :2 * (L // 2)].reshape(B, C, L // 2, 2), axis=-1)
    h = conv1d(h, w2, b2)
    h = (h - rm2[None, :, None]) / jnp.sqrt(rv2[None, :, None] + eps) \
        * g2[None, :, None] + be2[None, :, None]
    h = jnp.maximum(h, 0.0)
    feat = jnp.mean(h, axis=-1)                        # (B, 128)
    return jnp.maximum(feat @ wp.T + bp, 0.0)


def make_params(key):
    ks = jax.random.split(key, 10)
    w1 = jax.random.normal(ks[0], (64, 64, 3), jnp.float32) * 0.05   # Conv1d(64,64,3)
    b1 = jax.random.normal(ks[1], (64,), jnp.float32) * 0.05
    g1 = jax.random.uniform(ks[2], (64,), jnp.float32, 0.5, 1.5)     # BN1 weight
    be1 = jax.random.normal(ks[3], (64,), jnp.float32) * 0.1         # BN1 bias
    rm1 = jax.random.normal(ks[3], (64,), jnp.float32) * 0.1         # BN1 running_mean
    rv1 = jax.random.uniform(ks[4], (64,), jnp.float32, 0.5, 1.5)    # BN1 running_var
    w2 = jax.random.normal(ks[5], (128, 64, 3), jnp.float32) * 0.05  # Conv1d(64,128,3)
    b2 = jax.random.normal(ks[6], (128,), jnp.float32) * 0.05
    g2 = jax.random.uniform(ks[7], (128,), jnp.float32, 0.5, 1.5)
    be2 = jax.random.normal(ks[8], (128,), jnp.float32) * 0.1
    rm2 = jax.random.normal(ks[8], (128,), jnp.float32) * 0.1
    rv2 = jax.random.uniform(ks[9], (128,), jnp.float32, 0.5, 1.5)
    wp = jax.random.normal(ks[0], (128, 128), jnp.float32) * 0.05    # Linear(128,128)
    bp = jax.random.normal(ks[1], (128,), jnp.float32) * 0.05
    return (w1, b1, g1, be1, rm1, rv1, w2, b2, g2, be2, rm2, rv2, wp, bp)


if __name__ == "__main__":
    key = jax.random.PRNGKey(0)
    kx, kp = jax.random.split(key)
    params = make_params(kp)

    # Small single-chunk case (matches the PyTorch module's expected input layout).
    B, T = 2, 16
    x = jax.random.normal(kx, (B, 1, 64, T), jnp.float32)
    out = jax.block_until_ready(audio_encoder(x, params))
    assert out.shape == (B, 128), out.shape
    ref = jax.block_until_ready(reference(x, params))
    assert jnp.allclose(out, ref, atol=5e-2, rtol=5e-2), float(jnp.max(jnp.abs(out - ref)))

    # Multi-chunk / multi-batch-tile case exercising the halo carries, interior (unmasked)
    # chunks, edge masking, odd T and batch padding.
    B2, Tlong = 10, 199
    x2 = jax.random.normal(jax.random.PRNGKey(1), (B2, 1, 64, Tlong), jnp.float32)
    out2 = jax.block_until_ready(audio_encoder(x2, params, b_tile=8, t_chunk=32))
    assert out2.shape == (B2, 128), out2.shape
    ref2 = jax.block_until_ready(reference(x2, params))
    assert jnp.allclose(out2, ref2, atol=5e-2, rtol=5e-2), float(jnp.max(jnp.abs(out2 - ref2)))

    print("KERNEL_OK")
</pallas_src>

<mosaic_0001>
module attributes {stable_mosaic.version = 11 : i64} {
  func.func @_audio_encoder_kernel(%arg0: i32, %arg1: i32, %arg2: memref<8x8x256xbf16, #tpu.memory_space<vmem>>, %arg3: memref<128x256xbf16, #tpu.memory_space<vmem>>, %arg4: memref<256x256xbf16, #tpu.memory_space<vmem>>, %arg5: memref<1x256xf32, #tpu.memory_space<vmem>>, %arg6: memref<1x256xf32, #tpu.memory_space<vmem>>, %arg7: memref<256x256xbf16, #tpu.memory_space<vmem>>, %arg8: memref<1x256xf32, #tpu.memory_space<vmem>>, %arg9: memref<1x256xf32, #tpu.memory_space<vmem>>, %arg10: memref<128x128xf32, #tpu.memory_space<vmem>>, %arg11: memref<1x128xf32, #tpu.memory_space<vmem>>, %arg12: memref<8x128xf32, #tpu.memory_space<vmem>>, %arg13: memref<8x1x128xbf16, #tpu.memory_space<vmem>>, %arg14: memref<8x1x128xbf16, #tpu.memory_space<vmem>>, %arg15: memref<8x128xf32, #tpu.memory_space<vmem>>) attributes {dimension_semantics = [#tpu.dimension_semantics<parallel>, #tpu.dimension_semantics<arbitrary>], iteration_bounds = array<i64: 1, 1>, scalar_prefetch = 0 : i64, scratch_operands = 3 : i64, tpu.core_type = #tpu.core_type<tc>, window_params = [{transform_indices = @transform_0, window_bounds = array<i64: 8, 8, 256>}, {pipeline_mode = #tpu.pipeline_mode<synchronous>, transform_indices = @transform_1, window_bounds = array<i64: 128, 256>}, {pipeline_mode = #tpu.pipeline_mode<synchronous>, transform_indices = @transform_2, window_bounds = array<i64: 256, 256>}, {pipeline_mode = #tpu.pipeline_mode<synchronous>, transform_indices = @transform_3, window_bounds = array<i64: 1, 256>}, {pipeline_mode = #tpu.pipeline_mode<synchronous>, transform_indices = @transform_4, window_bounds = array<i64: 1, 256>}, {pipeline_mode = #tpu.pipeline_mode<synchronous>, transform_indices = @transform_5, window_bounds = array<i64: 256, 256>}, {pipeline_mode = #tpu.pipeline_mode<synchronous>, transform_indices = @transform_6, window_bounds = array<i64: 1, 256>}, {pipeline_mode = #tpu.pipeline_mode<synchronous>, transform_indices = @transform_7, window_bounds = array<i64: 1, 256>}, {pipeline_mode = #tpu.pipeline_mode<synchronous>, transform_indices = @transform_8, window_bounds = array<i64: 128, 128>}, {pipeline_mode = #tpu.pipeline_mode<synchronous>, transform_indices = @transform_9, window_bounds = array<i64: 1, 128>}, {transform_indices = @transform_10, window_bounds = array<i64: 8, 128>}]} {
    %c0_i32 = arith.constant 0 : i32
    %0 = arith.cmpi eq, %arg1, %c0_i32 : i32
    %1 = arith.extui %0 : i1 to i32
    %c0_i32_0 = arith.constant 0 : i32
    %2 = arith.cmpi ne, %1, %c0_i32_0 : i32
    scf.if %2 {
      %cst_39 = arith.constant 0.000000e+00 : f32
      %60 = vector.broadcast %cst_39 : f32 to vector<8x128xf32>
      %c0_40 = arith.constant 0 : index
      %c0_41 = arith.constant 0 : index
      %61 = vector.load %arg15[%c0_40, %c0_41] : memref<8x128xf32, #tpu.memory_space<vmem>>, vector<8x128xf32>
      tpu.vector_store %arg15[%c0_40, %c0_41], %60 {strides = array<i32>} : memref<8x128xf32, #tpu.memory_space<vmem>>, vector<8x128xf32>,
      %cst_42 = arith.constant 0.000000e+00 : bf16
      %62 = vector.broadcast %cst_42 : bf16 to vector<8x1x128xbf16>
      %c0_43 = arith.constant 0 : index
      %c0_44 = arith.constant 0 : index
      %c0_45 = arith.constant 0 : index
      %63 = vector.load %arg13[%c0_43, %c0_44, %c0_45] : memref<8x1x128xbf16, #tpu.memory_space<vmem>>, vector<8x1x128xbf16>
      tpu.vector_store %arg13[%c0_43, %c0_44, %c0_45], %62 {strides = array<i32>} : memref<8x1x128xbf16, #tpu.memory_space<vmem>>, vector<8x1x128xbf16>,
      %cst_46 = arith.constant 0.000000e+00 : bf16
      %64 = vector.broadcast %cst_46 : bf16 to vector<8x1x128xbf16>
      %c0_47 = arith.constant 0 : index
      %c0_48 = arith.constant 0 : index
      %c0_49 = arith.constant 0 : index
      %65 = vector.load %arg14[%c0_47, %c0_48, %c0_49] : memref<8x1x128xbf16, #tpu.memory_space<vmem>>, vector<8x1x128xbf16>
      tpu.vector_store %arg14[%c0_47, %c0_48, %c0_49], %64 {strides = array<i32>} : memref<8x1x128xbf16, #tpu.memory_space<vmem>>, vector<8x1x128xbf16>,
    } else {
    }
    %c0 = arith.constant 0 : index
    %c0_1 = arith.constant 0 : index
    %c0_2 = arith.constant 0 : index
    %3 = vector.load %arg2[%c0, %c0_1, %c0_2] : memref<8x8x256xbf16, #tpu.memory_space<vmem>>, vector<8x8x256xbf16>
    %c0_3 = arith.constant 0 : index
    %c0_4 = arith.constant 0 : index
    %c0_5 = arith.constant 0 : index
    %4 = vector.load %arg13[%c0_3, %c0_4, %c0_5] : memref<8x1x128xbf16, #tpu.memory_space<vmem>>, vector<8x1x128xbf16>
    %5 = vector.extract_strided_slice %3 {offsets = [0, 0, 128], sizes = [8, 7, 128], strides = [1, 1, 1]} : vector<8x8x256xbf16> to vector<8x7x128xbf16>
    %6 = tpu.concatenate %4, %5 in 1 : vector<8x1x128xbf16>, vector<8x7x128xbf16> -> vector<8x8x128xbf16>
    %7 = vector.extract_strided_slice %3 {offsets = [0, 7, 128], sizes = [8, 1, 128], strides = [1, 1, 1]} : vector<8x8x256xbf16> to vector<8x1x128xbf16>
    %c0_6 = arith.constant 0 : index
    %c0_7 = arith.constant 0 : index
    %c0_8 = arith.constant 0 : index
    %8 = vector.load %arg13[%c0_6, %c0_7, %c0_8] : memref<8x1x128xbf16, #tpu.memory_space<vmem>>, vector<8x1x128xbf16>
    tpu.vector_store %arg13[%c0_6, %c0_7, %c0_8], %7 {strides = array<i32>} : memref<8x1x128xbf16, #tpu.memory_space<vmem>>, vector<8x1x128xbf16>,
    %9 = vector.shape_cast %3 : vector<8x8x256xbf16> to vector<64x256xbf16>
    %c0_9 = arith.constant 0 : index
    %c0_10 = arith.constant 0 : index
    %10 = vector.load %arg4[%c0_9, %c0_10] : memref<256x256xbf16, #tpu.memory_space<vmem>>, vector<256x256xbf16>
    %cst = arith.constant dense<0.000000e+00> : vector<64x256xf32>
    %11 = tpu.matmul %9, %10, %cst {dimension_numbers = #tpu.dot_dimension_numbers<[1], [0], [0], [1], [0, 0, 1, 1], [], []>} : vector<64x256xbf16>, vector<256x256xbf16>, vector<64x256xf32> -> vector<64x256xf32>
    %12 = vector.shape_cast %6 : vector<8x8x128xbf16> to vector<64x128xbf16>
    %c0_11 = arith.constant 0 : index
    %c0_12 = arith.constant 0 : index
    %13 = vector.load %arg3[%c0_11, %c0_12] : memref<128x256xbf16, #tpu.memory_space<vmem>>, vector<128x256xbf16>
    %cst_13 = arith.constant dense<0.000000e+00> : vector<64x256xf32>
    %14 = tpu.matmul %12, %13, %cst_13 {dimension_numbers = #tpu.dot_dimension_numbers<[1], [0], [0], [1], [0, 0, 1, 1], [], []>} : vector<64x128xbf16>, vector<128x256xbf16>, vector<64x256xf32> -> vector<64x256xf32>
    %15 = arith.addf %11, %14 : vector<64x256xf32>
    %c0_14 = arith.constant 0 : index
    %c0_15 = arith.constant 0 : index
    %16 = vector.load %arg5[%c0_14, %c0_15] : memref<1x256xf32, #tpu.memory_space<vmem>>, vector<1x256xf32>
    %17 = vector.broadcast %16 : vector<1x256xf32> to vector<64x256xf32>
    %18 = arith.mulf %15, %17 : vector<64x256xf32>
    %c0_16 = arith.constant 0 : index
    %c0_17 = arith.constant 0 : index
    %19 = vector.load %arg6[%c0_16, %c0_17] : memref<1x256xf32, #tpu.memory_space<vmem>>, vector<1x256xf32>
    %20 = vector.broadcast %19 : vector<1x256xf32> to vector<64x256xf32>
    %21 = arith.addf %18, %20 : vector<64x256xf32>
    %cst_18 = arith.constant 0.000000e+00 : f32
    %22 = vector.broadcast %cst_18 : f32 to vector<64x256xf32>
    %23 = arith.maximumf %21, %22 : vector<64x256xf32>
    %24 = vector.extract_strided_slice %23 {offsets = [0, 0], sizes = [64, 128], strides = [1, 1]} : vector<64x256xf32> to vector<64x128xf32>
    %25 = vector.extract_strided_slice %23 {offsets = [0, 128], sizes = [64, 128], strides = [1, 1]} : vector<64x256xf32> to vector<64x128xf32>
    %26 = arith.maximumf %24, %25 : vector<64x128xf32>
    %27 = arith.truncf %26 : vector<64x128xf32> to vector<64x128xbf16>
    %28 = vector.shape_cast %27 : vector<64x128xbf16> to vector<8x8x128xbf16>
    %c0_19 = arith.constant 0 : index
    %c0_20 = arith.constant 0 : index
    %c0_21 = arith.constant 0 : index
    %29 = vector.load %arg14[%c0_19, %c0_20, %c0_21] : memref<8x1x128xbf16, #tpu.memory_space<vmem>>, vector<8x1x128xbf16>
    %30 = vector.extract_strided_slice %28 {offsets = [0, 0, 0], sizes = [8, 7, 128], strides = [1, 1, 1]} : vector<8x8x128xbf16> to vector<8x7x128xbf16>
    %31 = tpu.concatenate %29, %30 in 1 : vector<8x1x128xbf16>, vector<8x7x128xbf16> -> vector<8x8x128xbf16>
    %32 = vector.extract_strided_slice %28 {offsets = [0, 7, 0], sizes = [8, 1, 128], strides = [1, 1, 1]} : vector<8x8x128xbf16> to vector<8x1x128xbf16>
    %c0_22 = arith.constant 0 : index
    %c0_23 = arith.constant 0 : index
    %c0_24 = arith.constant 0 : index
    %33 = vector.load %arg14[%c0_22, %c0_23, %c0_24] : memref<8x1x128xbf16, #tpu.memory_space<vmem>>, vector<8x1x128xbf16>
    tpu.vector_store %arg14[%c0_22, %c0_23, %c0_24], %32 {strides = array<i32>} : memref<8x1x128xbf16, #tpu.memory_space<vmem>>, vector<8x1x128xbf16>,
    %34 = tpu.concatenate %31, %28 in 2 : vector<8x8x128xbf16>, vector<8x8x128xbf16> -> vector<8x8x256xbf16>
    %35 = vector.shape_cast %34 : vector<8x8x256xbf16> to vector<64x256xbf16>
    %c0_25 = arith.constant 0 : index
    %c0_26 = arith.constant 0 : index
    %36 = vector.load %arg7[%c0_25, %c0_26] : memref<256x256xbf16, #tpu.memory_space<vmem>>, vector<256x256xbf16>
    %cst_27 = arith.constant dense<0.000000e+00> : vector<64x256xf32>
    %37 = tpu.matmul %35, %36, %cst_27 {dimension_numbers = #tpu.dot_dimension_numbers<[1], [0], [0], [1], [0, 0, 1, 1], [], []>} : vector<64x256xbf16>, vector<256x256xbf16>, vector<64x256xf32> -> vector<64x256xf32>
    %c0_28 = arith.constant 0 : index
    %c0_29 = arith.constant 0 : index
    %38 = vector.load %arg8[%c0_28, %c0_29] : memref<1x256xf32, #tpu.memory_space<vmem>>, vector<1x256xf32>
    %39 = vector.broadcast %38 : vector<1x256xf32> to vector<64x256xf32>
    %40 = arith.mulf %37, %39 : vector<64x256xf32>
    %c0_30 = arith.constant 0 : index
    %c0_31 = arith.constant 0 : index
    %41 = vector.load %arg9[%c0_30, %c0_31] : memref<1x256xf32, #tpu.memory_space<vmem>>, vector<1x256xf32>
    %42 = vector.broadcast %41 : vector<1x256xf32> to vector<64x256xf32>
    %43 = arith.addf %40, %42 : vector<64x256xf32>
    %cst_32 = arith.constant 0.000000e+00 : f32
    %44 = vector.broadcast %cst_32 : f32 to vector<64x256xf32>
    %45 = arith.maximumf %43, %44 : vector<64x256xf32>
    %46 = vector.shape_cast %45 : vector<64x256xf32> to vector<8x8x256xf32>
    %47 = vector.extract_strided_slice %46 {offsets = [0, 0, 0], sizes = [8, 8, 128], strides = [1, 1, 1]} : vector<8x8x256xf32> to vector<8x8x128xf32>
    %48 = vector.extract_strided_slice %46 {offsets = [0, 0, 128], sizes = [8, 8, 128], strides = [1, 1, 1]} : vector<8x8x256xf32> to vector<8x8x128xf32>
    %c0_i32_33 = arith.constant 0 : i32
    %49 = arith.cmpi eq, %arg1, %c0_i32_33 : i32
    %c0_i32_34 = arith.constant 0 : i32
    %50 = arith.cmpi eq, %arg1, %c0_i32_34 : i32
    %51 = arith.ori %49, %50 : i1
    %52 = arith.extui %51 : i1 to i32
    %c0_i32_35 = arith.constant 0 : i32
    %53 = arith.cmpi ne, %52, %c0_i32_35 : i32
    scf.if %53 {
      %60 = tpu.iota {dimensions = array<i32: 1>} : vector<1x8x1xi32>
      %c8_i32 = arith.constant 8 : i32
      %61 = arith.muli %arg1, %c8_i32 : i32
      %62 = vector.broadcast %61 : i32 to vector<1x8x1xi32>
      %63 = arith.addi %62, %60 : vector<1x8x1xi32>
      %c2_i32 = arith.constant 2 : i32
      %64 = vector.broadcast %c2_i32 : i32 to vector<1x8x1xi32>
      %65 = arith.muli %64, %63 : vector<1x8x1xi32>
      %c3_i32 = arith.constant 3 : i32
      %66 = vector.broadcast %c3_i32 : i32 to vector<1x8x1xi32>
      %67 = arith.subi %65, %66 : vector<1x8x1xi32>
      %c0_i32_39 = arith.constant 0 : i32
      %68 = vector.broadcast %c0_i32_39 : i32 to vector<1x8x1xi32>
      %69 = arith.cmpi sge, %67, %68 : vector<1x8x1xi32>
      %c5_i32 = arith.constant 5 : i32
      %70 = vector.broadcast %c5_i32 : i32 to vector<1x8x1xi32>
      %71 = arith.cmpi slt, %67, %70 : vector<1x8x1xi32>
      %72 = arith.andi %69, %71 : vector<1x8x1xi1>
      %c1_i32 = arith.constant 1 : i32
      %73 = vector.broadcast %c1_i32 : i32 to vector<1x8x1xi32>
      %74 = arith.addi %67, %73 : vector<1x8x1xi32>
      %c0_i32_40 = arith.constant 0 : i32
      %75 = vector.broadcast %c0_i32_40 : i32 to vector<1x8x1xi32>
      %76 = arith.cmpi sge, %74, %75 : vector<1x8x1xi32>
      %c1_i32_41 = arith.constant 1 : i32
      %77 = vector.broadcast %c1_i32_41 : i32 to vector<1x8x1xi32>
      %78 = arith.addi %67, %77 : vector<1x8x1xi32>
      %c5_i32_42 = arith.constant 5 : i32
      %79 = vector.broadcast %c5_i32_42 : i32 to vector<1x8x1xi32>
      %80 = arith.cmpi slt, %78, %79 : vector<1x8x1xi32>
      %81 = arith.andi %76, %80 : vector<1x8x1xi1>
      %c0_43 = arith.constant 0 : index
      %c0_44 = arith.constant 0 : index
      %82 = vector.load %arg15[%c0_43, %c0_44] : memref<8x128xf32, #tpu.memory_space<vmem>>, vector<8x128xf32>
      %cst_45 = arith.constant 0.000000e+00 : f32
      %83 = vector.shape_cast %72 : vector<1x8x1xi1> to vector<1x8x1xi1>
      %84 = vector.broadcast %83 : vector<1x8x1xi1> to vector<8x8x128xi1>
      %85 = vector.broadcast %cst_45 : f32 to vector<8x8x128xf32>
      %86 = arith.select %84, %47, %85 : vector<8x8x128xi1>, vector<8x8x128xf32>
      %cst_46 = arith.constant 0.000000e+00 : f32
      %87 = vector.shape_cast %81 : vector<1x8x1xi1> to vector<1x8x1xi1>
      %88 = vector.broadcast %87 : vector<1x8x1xi1> to vector<8x8x128xi1>
      %89 = vector.broadcast %cst_46 : f32 to vector<8x8x128xf32>
      %90 = arith.select %88, %48, %89 : vector<8x8x128xi1>, vector<8x8x128xf32>
      %91 = arith.addf %86, %90 : vector<8x8x128xf32>
      %cst_47 = arith.constant dense<0.000000e+00> : vector<8x128xf32>
      %92 = vector.multi_reduction <add>, %91, %cst_47 [1] : vector<8x8x128xf32> to vector<8x128xf32>
      %93 = arith.addf %82, %92 : vector<8x128xf32>
      %c0_48 = arith.constant 0 : index
      %c0_49 = arith.constant 0 : index
      %94 = vector.load %arg15[%c0_48, %c0_49] : memref<8x128xf32, #tpu.memory_space<vmem>>, vector<8x128xf32>
      tpu.vector_store %arg15[%c0_48, %c0_49], %93 {strides = array<i32>} : memref<8x128xf32, #tpu.memory_space<vmem>>, vector<8x128xf32>,
    } else {
    }
    %true = arith.constant true
    %54 = arith.xori %51, %true : i1
    %55 = arith.extui %54 : i1 to i32
    %c0_i32_36 = arith.constant 0 : i32
    %56 = arith.cmpi ne, %55, %c0_i32_36 : i32
    scf.if %56 {
      %c0_39 = arith.constant 0 : index
      %c0_40 = arith.constant 0 : index
      %60 = vector.load %arg15[%c0_39, %c0_40] : memref<8x128xf32, #tpu.memory_space<vmem>>, vector<8x128xf32>
      %61 = arith.addf %47, %48 : vector<8x8x128xf32>
      %cst_41 = arith.constant dense<0.000000e+00> : vector<8x128xf32>
      %62 = vector.multi_reduction <add>, %61, %cst_41 [1] : vector<8x8x128xf32> to vector<8x128xf32>
      %63 = arith.addf %60, %62 : vector<8x128xf32>
      %c0_42 = arith.constant 0 : index
      %c0_43 = arith.constant 0 : index
      %64 = vector.load %arg15[%c0_42, %c0_43] : memref<8x128xf32, #tpu.memory_space<vmem>>, vector<8x128xf32>
      tpu.vector_store %arg15[%c0_42, %c0_43], %63 {strides = array<i32>} : memref<8x128xf32, #tpu.memory_space<vmem>>, vector<8x128xf32>,
    } else {
    }
    %c0_i32_37 = arith.constant 0 : i32
    %57 = arith.cmpi eq, %arg1, %c0_i32_37 : i32
    %58 = arith.extui %57 : i1 to i32
    %c0_i32_38 = arith.constant 0 : i32
    %59 = arith.cmpi ne, %58, %c0_i32_38 : i32
    scf.if %59 {
      %c0_39 = arith.constant 0 : index
      %c0_40 = arith.constant 0 : index
      %60 = vector.load %arg15[%c0_39, %c0_40] : memref<8x128xf32, #tpu.memory_space<vmem>>, vector<8x128xf32>
      %cst_41 = arith.constant 2.000000e-01 : f32
      %61 = vector.broadcast %cst_41 : f32 to vector<8x128xf32>
      %62 = arith.mulf %60, %61 : vector<8x128xf32>
      %c0_42 = arith.constant 0 : index
      %c0_43 = arith.constant 0 : index
      %63 = vector.load %arg10[%c0_42, %c0_43] : memref<128x128xf32, #tpu.memory_space<vmem>>, vector<128x128xf32>
      %cst_44 = arith.constant dense<0.000000e+00> : vector<8x128xf32>
      %64 = tpu.matmul %62, %63, %cst_44 {dimension_numbers = #tpu.dot_dimension_numbers<[1], [0], [0], [1], [0, 0, 1, 1], [], []>} : vector<8x128xf32>, vector<128x128xf32>, vector<8x128xf32> -> vector<8x128xf32>
      %c0_45 = arith.constant 0 : index
      %c0_46 = arith.constant 0 : index
      %65 = vector.load %arg11[%c0_45, %c0_46] : memref<1x128xf32, #tpu.memory_space<vmem>>, vector<1x128xf32>
      %66 = vector.broadcast %65 : vector<1x128xf32> to vector<8x128xf32>
      %67 = arith.addf %64, %66 : vector<8x128xf32>
      %cst_47 = arith.constant 0.000000e+00 : f32
      %68 = vector.broadcast %cst_47 : f32 to vector<8x128xf32>
      %69 = arith.maximumf %67, %68 : vector<8x128xf32>
      %c0_48 = arith.constant 0 : index
      %c0_49 = arith.constant 0 : index
      %70 = vector.load %arg12[%c0_48, %c0_49] : memref<8x128xf32, #tpu.memory_space<vmem>>, vector<8x128xf32>
      tpu.vector_store %arg12[%c0_48, %c0_49], %69 {strides = array<i32>} : memref<8x128xf32, #tpu.memory_space<vmem>>, vector<8x128xf32>,
    } else {
    }
    return
  }
  func.func @transform_0(%arg0: i32, %arg1: i32) -> (i32, i32, i32) {
    %c0_i32 = arith.constant 0 : i32
    %c0_i32_0 = arith.constant 0 : i32
    return %arg0, %arg1, %c0_i32 : i32, i32, i32
  }
  func.func @transform_1(%arg0: i32, %arg1: i32) -> (i32, i32) {
    %c0_i32 = arith.constant 0 : i32
    %c0_i32_0 = arith.constant 0 : i32
    %c0_i32_1 = arith.constant 0 : i32
    return %c0_i32, %c0_i32_0 : i32, i32
  }
  func.func @transform_2(%arg0: i32, %arg1: i32) -> (i32, i32) {
    %c0_i32 = arith.constant 0 : i32
    %c0_i32_0 = arith.constant 0 : i32
    %c0_i32_1 = arith.constant 0 : i32
    return %c0_i32, %c0_i32_0 : i32, i32
  }
  func.func @transform_3(%arg0: i32, %arg1: i32) -> (i32, i32) {
    %c0_i32 = arith.constant 0 : i32
    %c0_i32_0 = arith.constant 0 : i32
    %c0_i32_1 = arith.constant 0 : i32
    return %c0_i32, %c0_i32_0 : i32, i32
  }
  func.func @transform_4(%arg0: i32, %arg1: i32) -> (i32, i32) {
    %c0_i32 = arith.constant 0 : i32
    %c0_i32_0 = arith.constant 0 : i32
    %c0_i32_1 = arith.constant 0 : i32
    return %c0_i32, %c0_i32_0 : i32, i32
  }
  func.func @transform_5(%arg0: i32, %arg1: i32) -> (i32, i32) {
    %c0_i32 = arith.constant 0 : i32
    %c0_i32_0 = arith.constant 0 : i32
    %c0_i32_1 = arith.constant 0 : i32
    return %c0_i32, %c0_i32_0 : i32, i32
  }
  func.func @transform_6(%arg0: i32, %arg1: i32) -> (i32, i32) {
    %c0_i32 = arith.constant 0 : i32
    %c0_i32_0 = arith.constant 0 : i32
    %c0_i32_1 = arith.constant 0 : i32
    return %c0_i32, %c0_i32_0 : i32, i32
  }
  func.func @transform_7(%arg0: i32, %arg1: i32) -> (i32, i32) {
    %c0_i32 = arith.constant 0 : i32
    %c0_i32_0 = arith.constant 0 : i32
    %c0_i32_1 = arith.constant 0 : i32
    return %c0_i32, %c0_i32_0 : i32, i32
  }
  func.func @transform_8(%arg0: i32, %arg1: i32) -> (i32, i32) {
    %c0_i32 = arith.constant 0 : i32
    %c0_i32_0 = arith.constant 0 : i32
    %c0_i32_1 = arith.constant 0 : i32
    return %c0_i32, %c0_i32_0 : i32, i32
  }
  func.func @transform_9(%arg0: i32, %arg1: i32) -> (i32, i32) {
    %c0_i32 = arith.constant 0 : i32
    %c0_i32_0 = arith.constant 0 : i32
    %c0_i32_1 = arith.constant 0 : i32
    return %c0_i32, %c0_i32_0 : i32, i32
  }
  func.func @transform_10(%arg0: i32, %arg1: i32) -> (i32, i32) {
    %c0_i32 = arith.constant 0 : i32
    %c0_i32_0 = arith.constant 0 : i32
    return %arg0, %c0_i32 : i32, i32
  }
}

</mosaic_0001>

<bundles_post_ra>
// kernel: tpu_custom_call.1
= control target key start
LH: loop header
LB: loop body
LE: loop exit
PB: predicated region body
PF: predicated region fallthrough
CT: control target
= control target key end

     0   :  { %15 = vsyncpa [#allocation6], 0  ;;  %s2969_s0 = inlined_call_operand.hbm [shape: bf16[8,8,256], index: 0, kind: input, shape index: {}]   ;;  %s2970_s1 = inlined_call_operand.hbm [shape: bf16[128,256], index: 1, kind: input, shape index: {}]   ;;  %s2971_s2 = inlined_call_operand.hbm [shape: bf16[256,256], index: 2, kind: input, shape index: {}]   ;;  %s2972_s3 = inlined_call_operand.vmem [shape: f32[1,256], index: 3, kind: input, shape index: {}]   ;;  %s2973_s4 = inlined_call_operand.vmem [shape: f32[1,256], index: 4, kind: input, shape index: {}]   ;;  %s2974_s5 = inlined_call_operand.hbm [shape: bf16[256,256], index: 5, kind: input, shape index: {}]   ;;  %s2975_s6 = inlined_call_operand.vmem [shape: f32[1,256], index: 6, kind: input, shape index: {}]   ;;  %s2976_s7 = inlined_call_operand.vmem [shape: f32[1,256], index: 7, kind: input, shape index: {}]   ;;  %s2977_s8 = inlined_call_operand.hbm [shape: f32[128,128], index: 8, kind: input, shape index: {}]   ;;  %s2978_s9 = inlined_call_operand.vmem [shape: f32[1,128], index: 9, kind: input, shape index: {}]   ;;  %s2979_s10 = inlined_call_operand.hbm [shape: f32[8,128], index: 10, kind: output, shape index: {}]  }
   0x1   :  { %16 = vsyncpa [#allocation9], 0 }
   0x2   :  { %17 = vsyncpa [#allocation12], 0 }
   0x3   :  { %18 = vsyncpa [#allocation7], 0  ;;  %s2513_s13 = smov [#allocation8]   ;;  %s2514_s15 = smov [#allocation11]  }
   0x4   :  { %s36_s14 = sshll.u32 %s2513_s13, 4  ;;  %s64_s16 = sshll.u32 %s2514_s15, 4  ;;  %s37_s14 = int_to_ptr.vmem [resolvable:$true] %s36_s14  ;;  %s65_s16 = int_to_ptr.vmem [resolvable:$true] %s64_s16 }
   0x5   :  { %s2393_s17 = scalar_lea.vmem %s37_s14, 2048  ;;  %p2398_p1 = scmp.lt.s32.totalorder %s37_s14, %s37_s14 }
   0x6   :  { %p2394_p0 = scmp.ne.s32.totalorder %s37_s14, %s2393_s17  ;;  %p2399_p2 = scmp.lt.s32.totalorder %s2393_s17, %s2393_s17 }
   0x8   :  { %p2400_p3 = por %p2399_p2, %p2398_p1 }
   0xa   :  { %p2401_p4 = pnand %p2400_p3, %p2394_p0 }
   0xc   :  { %2404 = shalt.err (!%p2401_p4)
}
   0xd   :  { %s2515_s18 = smov 128   ;;  %s2516_s19 = smov 8  }
   0xe   :  { %42 = dma.hbm_to_vmem [thread:$0]  %s2970_s1, 2048, %s37_s14, [#allocation9], %s2515_s18, %s2515_s18, %s2516_s19  }
   0xf   :  { %s2413_s22 = scalar_lea.vmem %s65_s16, 4096  ;;  %p2418_p6 = scmp.lt.s32.totalorder %s65_s16, %s65_s16 }
  0x10   :  { %p2414_p5 = scmp.ne.s32.totalorder %s65_s16, %s2413_s22  ;;  %p2419_p7 = scmp.lt.s32.totalorder %s2413_s22, %s2413_s22 }
  0x12   :  { %p2420_p8 = por %p2419_p7, %p2418_p6 }
  0x14   :  { %p2421_p9 = pnand %p2420_p8, %p2414_p5 }
  0x16   :  { %2424 = shalt.err (!%p2421_p9)
}
  0x17   :  { %70 = dma.hbm_to_vmem [thread:$0]  %s2974_s5, 4096, %s65_s16, [#allocation12], %s2515_s18, %s2515_s18, %s2516_s19  }
  0x18   :  { %s2517_s25 = smov [#allocation5]   ;;  %s2518_s27 = smov [#allocation10]  }
  0x19   :  { %s24_s26 = sshll.u32 %s2517_s25, 4  ;;  %s48_s28 = sshll.u32 %s2518_s27, 4  ;;  %s25_s26 = int_to_ptr.vmem [resolvable:$true] %s24_s26  ;;  %s49_s28 = int_to_ptr.vmem [resolvable:$true] %s48_s28 }
  0x1a   :  { %s2433_s1 = scalar_lea.vmem %s25_s26, 1024  ;;  %p2438_p11 = scmp.lt.s32.totalorder %s25_s26, %s25_s26 }
  0x1b   :  { %p2434_p10 = scmp.ne.s32.totalorder %s25_s26, %s2433_s1  ;;  %p2439_p12 = scmp.lt.s32.totalorder %s2433_s1, %s2433_s1 }
  0x1d   :  { %p2440_p13 = por %p2439_p12, %p2438_p11 }
  0x1f   :  { %p2441_p0 = pnand %p2440_p13, %p2434_p10 }
  0x21   :  { %2444 = shalt.err (!%p2441_p0)
}
  0x22   :  { %30 = dma.hbm_to_vmem [thread:$0]  %s2969_s0, 1024, %s25_s26, [#allocation6], %s2515_s18, %s2515_s18, %s2516_s19  }
  0x23   :  { %s2453_s5 = scalar_lea.vmem %s49_s28, 4096  ;;  %p2458_p2 = scmp.lt.s32.totalorder %s49_s28, %s49_s28 }
  0x24   :  { %p2454_p1 = scmp.ne.s32.totalorder %s49_s28, %s2453_s5  ;;  %p2459_p3 = scmp.lt.s32.totalorder %s2453_s5, %s2453_s5 }
  0x26   :  { %p2460_p4 = por %p2459_p3, %p2458_p2 }
  0x28   :  { %p2461_p5 = pnand %p2460_p4, %p2454_p1 }
  0x2a   :  { %2464 = shalt.err (!%p2461_p5)
}
  0x2b   :  { %54 = dma.hbm_to_vmem [thread:$0]  %s2971_s2, 4096, %s49_s28, [#allocation9], %s2515_s18, %s2515_s18, %s2516_s19  }
  0x2c   :  { %s2519_s13 = smov [#allocation13]  }
  0x2d   :  { %s80_s14 = sshll.u32 %s2519_s13, 4  ;;  %s81_s14 = int_to_ptr.vmem [resolvable:$true] %s80_s14 }
  0x2e   :  { %s2473_s15 = scalar_lea.vmem %s81_s14, 2048  ;;  %p2478_p7 = scmp.lt.s32.totalorder %s81_s14, %s81_s14 }
  0x2f   :  { %p2474_p6 = scmp.ne.s32.totalorder %s81_s14, %s2473_s15  ;;  %p2479_p8 = scmp.lt.s32.totalorder %s2473_s15, %s2473_s15 }
  0x31   :  { %p2480_p9 = por %p2479_p8, %p2478_p7 }
  0x33   :  { %p2481_p10 = pnand %p2480_p9, %p2474_p6 }
  0x35   :  { %2484 = shalt.err (!%p2481_p10)
}
  0x36   :  { %86 = dma.hbm_to_vmem [thread:$0]  %s2977_s8, 2048, %s81_s14, [#allocation12], %s2515_s18, %s2515_s18, %s2516_s19  }
  0x37   :  { %2505 = dma.done.wait [#allocation6], 1024  }
  0x38   :  { %2506 = vsyncadd [#allocation6], 4294966272 }
  0x39   :  { %2507 = dma.done.wait [#allocation9], 6144  }
  0x3a   :  { %2508 = vsyncadd [#allocation9], 4294961152 }
  0x3b   :  { %2509 = dma.done.wait [#allocation12], 6144  }
  0x3c   :  { %2510 = vsyncadd [#allocation12], 4294961152  ;;  %v2520_v0 = vmov 0   ;;  %v2249_v1 = vld [vmem:[#allocation10 + $0x74] ss:$8 sps:$4 sm:$0xff]   ;;  %vm110_vm0 = vcmask 1040384   ;;  %v279_v27 = vlaneseq }
  0x3d   :  { %667 = vmatprep.mubr.bf16.mxu0 %v2520_v0  ;;  %v2251_v2 = vld [vmem:[#allocation10 + $0x70] ss:$8 sps:$4 sm:$0xff]   ;;  %892 = vmatprep.subr.bf16.mxu1 %v2249_v1  ;;  %v2252_v3 = vld [vmem:[#allocation10 + $0x64] ss:$8 sps:$4 sm:$0xff]   ;;  %v2254_v4 = vld [vmem:[#allocation10 + $0x60] ss:$8 sps:$4 sm:$0xff]  }
  0x3e   :  { %893 = vmatpush1.bf16.msra.mxu1 %v2251_v2  ;;  %v2255_v5 = vld [vmem:[#allocation10 + $0x54] ss:$8 sps:$4 sm:$0xff]   ;;  %v2257_v6 = vld [vmem:[#allocation10 + $0x50] ss:$8 sps:$4 sm:$0xff]   ;;  %v2258_v7 = vld [vmem:[#allocation10 + $0x44] ss:$8 sps:$4 sm:$0xff]  }
  0x3f   :  { %894 = vmatprep.subr.bf16.mxu1 %v2252_v3  ;;  %v2270_v8 = vld [vmem:[#allocation8 + $0x74] ss:$8 sps:$4 sm:$0xff]   ;;  %v2272_v9 = vld [vmem:[#allocation8 + $0x70] ss:$8 sps:$4 sm:$0xff]   ;;  %v2260_v10 = vld [vmem:[#allocation10 + $0x40] ss:$8 sps:$4 sm:$0xff]  }
  0x40   :  { %v2261_v11 = vld [vmem:[#allocation10 + $0x34] ss:$8 sps:$4 sm:$0xff]   ;;  %635 = vmatprep.subr.bf16.mxu0 %v2270_v8  ;;  %v2276_v12 = vld [vmem:[#allocation8 + $0x64] ss:$8 sps:$4 sm:$0xff]   ;;  %v2278_v13 = vld [vmem:[#allocation8 + $0x60] ss:$8 sps:$4 sm:$0xff]  }
  0x41   :  { %636 = vmatpush1.bf16.msra.mxu0 %v2272_v9  ;;  %v2263_v14 = vld [vmem:[#allocation10 + $0x30] ss:$8 sps:$4 sm:$0xff]   ;;  %v2282_v15 = vld [vmem:[#allocation8 + $0x54] ss:$8 sps:$4 sm:$0xff]   ;;  %v2264_v16 = vld [vmem:[#allocation10 + $0x24] ss:$8 sps:$4 sm:$0xff]  }
  0x42   :  { %895 = vmatpush1.bf16.msra.mxu1 %v2254_v4  ;;  %637 = vmatprep.subr.bf16.mxu0 %v2276_v12  ;;  %v2284_v17 = vld [vmem:[#allocation8 + $0x50] ss:$8 sps:$4 sm:$0xff]   ;;  %v2288_v18 = vld [vmem:[#allocation8 + $0x44] ss:$8 sps:$4 sm:$0xff]   ;;  %v2266_v19 = vld [vmem:[#allocation10 + $0x20] ss:$8 sps:$4 sm:$0xff]  }
  0x43   :  { %896 = vmatprep.subr.bf16.mxu1 %v2255_v5  ;;  %v2267_v20 = vld [vmem:[#allocation10 + $0x14] ss:$8 sps:$4 sm:$0xff]   ;;  %v2290_v21 = vld [vmem:[#allocation8 + $0x40] ss:$8 sps:$4 sm:$0xff]   ;;  %v2521_v23 = vmov 1966171168  }
  0x44   :  { %v2294_v22 = vld [vmem:[#allocation8 + $0x34] ss:$8 sps:$4 sm:$0xff]   ;;  %v277_v24 = vunpack.c.l.s4 %v2521_v23  ;;  %v2269_v25 = vld [vmem:[#allocation10 + $0x10] ss:$8 sps:$4 sm:$0xff]   ;;  %v2273_v26 = vld [vmem:[#allocation10 + $0x4] ss:$8 sps:$4 sm:$0xff]  }
  0x45   :  { %638 = vmatpush1.bf16.msra.mxu0 %v2278_v13  ;;  %vm111_vm1 = vsmask.f32 256  ;;  %v2296_v28 = vld [vmem:[#allocation8 + $0x30] ss:$8 sps:$4 sm:$0xff]   ;;  %v2300_v29 = vld [vmem:[#allocation8 + $0x24] ss:$8 sps:$4 sm:$0xff]  }
  0x46   :  { %897 = vmatpush1.bf16.msra.mxu1 %v2257_v6  ;;  %639 = vmatprep.subr.bf16.mxu0 %v2282_v15  ;;  %v278_v30 = vunpack.c.0.s8 %v277_v24  ;;  %v2275_v31 = vld [vmem:[#allocation10] ss:$8 sps:$4 sm:$0xff]   ;;  %vm2611_vm2 = vmand %vm110_vm0, %vm111_vm1  ;;  %v2279_v33 = vld [vmem:[#allocation10 + $0xf4] ss:$8 sps:$4 sm:$0xff]   ;;  %v2615_v34 = vshrl.u32 %v279_v27, 7  ;;  %vm2523_vm3 = vmmov 0  }
  0x47   :  { %898 = vmatprep.subr.bf16.mxu1 %v2258_v7  ;;  %v2281_v35 = vld [vmem:[#allocation10 + $0xf0] ss:$8 sps:$4 sm:$0xff]   ;;  %v2302_v36 = vld [vmem:[#allocation8 + $0x20] ss:$8 sps:$4 sm:$0xff]   ;;  %v2285_v37 = vld [vmem:[#allocation10 + $0xe4] ss:$8 sps:$4 sm:$0xff]  }
  0x48   :  { %v2306_v38 = vld [vmem:[#allocation8 + $0x14] ss:$8 sps:$4 sm:$0xff]   ;;  %v113_v39 = vld [vmem:[#allocation2] sm:$0x1]  ;;  %v2618_v40 = vsub.s32 %v278_v30, %v2615_v34  ;;  %v116_v42 = vld [vmem:[#allocation2 + $0x1] sm:$0x1] }
  0x49   :  { %640 = vmatpush1.bf16.msra.mxu0 %v2284_v17  ;;  %v114_v41 = vsel %vm2611_vm2, 0, %v113_v39  ;;  %v2622_v43 = vld [vmem:[#allocation5] sm:$0xff]  ;;  %v2624_v44 = vld [vmem:[#allocation5 + $0x8] sm:$0xff]  ;;  %v2308_v45 = vld [vmem:[#allocation8 + $0x10] ss:$8 sps:$4 sm:$0xff]   ;;  %v117_v46 = vsel %vm2611_vm2, 0, %v116_v42 }
  0x4a   :  { %899 = vmatpush1.bf16.msra.mxu1 %v2260_v10  ;;  %641 = vmatprep.subr.bf16.mxu0 %v2288_v18  ;;  %115 = vst [vmem:[#allocation2] sm:$0x1] %v114_v41  ;;  %v2039_v47 = vcombine.high %v2622_v43, %v2622_v43  ;;  %v2040_v48 = vcombine.high %v2624_v44, %v2624_v44  ;;  %v2312_v50 = vld [vmem:[#allocation8 + $0x4] ss:$8 sps:$4 sm:$0xff]   ;;  %118 = vst [vmem:[#allocation2 + $0x1] sm:$0x1] %v117_v46 }
  0x4b   :  { %900 = vmatprep.subr.bf16.mxu1 %v2261_v11  ;;  %v282_v49 = vrot.slane %v2622_v43, %v2618_v40  ;;  %v298_v51 = vrot.slane %v2624_v44, %v2618_v40  ;;  %v2084_v52 = vcombine.high %v2622_v43, %v2624_v44  ;;  %v119_v53 = vld [vmem:[#allocation2 + $0x2] sm:$0x1]  ;;  %v122_v54 = vld [vmem:[#allocation2 + $0x3] sm:$0x1]  ;;  %v2640_v60 = vld [vmem:[#allocation5 + $0x18] sm:$0xff]  ;;  %vm1819_vm10 = vcmask 1041409  }
  0x4c   :  { %v202_v55 = vshrl.u32 %v2039_v47, 16  ;;  %v205_v56 = vshll.u32 %v2039_v47, 16  ;;  %v209_v57 = vshrl.u32 %v2040_v48, 16  ;;  %v212_v58 = vshll.u32 %v2040_v48, 16  ;;  %v2638_v59 = vld [vmem:[#allocation5 + $0x10] sm:$0xff]  ;;  %s2524_s21 = smov [#allocation14]  }
  0x4d   :  { %642 = vmatpush1.bf16.msra.mxu0 %v2290_v21  ;;  %v2287_v61 = vld [vmem:[#allocation10 + $0xe0] ss:$8 sps:$4 sm:$0xff]   ;;  %v283_v62 = vcombine.high %v282_v49, %v282_v49  ;;  %v299_v63 = vcombine.high %v298_v51, %v298_v51  ;;  %924 = vmatprep.mubr.bf16.mxu1 %v2084_v52  ;;  %v120_v1 = vsel %vm2611_vm2, 0, %v119_v53  ;;  %v123_v2 = vsel %vm2611_vm2, 0, %v122_v54  ;;  %v2291_v3 = vld [vmem:[#allocation10 + $0xd4] ss:$8 sps:$4 sm:$0xff]  }
  0x4e   :  { %901 = vmatpush1.bf16.msra.mxu1 %v2263_v14  ;;  %643 = vmatprep.subr.bf16.mxu0 %v2294_v22  ;;  %v204_v4 = vrot.slane %v202_v55, 7  ;;  %v211_v5 = vrot.slane %v209_v57, 7  ;;  %121 = vst [vmem:[#allocation2 + $0x2] sm:$0x1] %v120_v1  ;;  %124 = vst [vmem:[#allocation2 + $0x3] sm:$0x1] %v123_v2  ;;  %v2041_v6 = vcombine.high %v2638_v59, %v2638_v59 }
  0x4f   :  { %902 = vmatprep.subr.bf16.mxu1 %v2264_v16  ;;  %v2042_v7 = vcombine.high %v2640_v60, %v2640_v60  ;;  %v2293_v8 = vld [vmem:[#allocation10 + $0xd0] ss:$8 sps:$4 sm:$0xff]   ;;  %v2314_v9 = vld [vmem:[#allocation8] ss:$8 sps:$4 sm:$0xff]   ;;  %v290_v10 = vrot.slane %v283_v62, %v2618_v40  ;;  %v306_v11 = vrot.slane %v299_v63, %v2618_v40  ;;  %v314_v12 = vrot.slane %v2638_v59, %v2618_v40  ;;  %v2297_v14 = vld [vmem:[#allocation10 + $0xc4] ss:$8 sps:$4 sm:$0xff]  }
  0x50   :  { %v330_v13 = vrot.slane %v2640_v60, %v2618_v40  ;;  %v207_v15 = vor.u32 %v205_v56, %v204_v4  ;;  %v214_v16 = vor.u32 %v212_v58, %v211_v5  ;;  %v216_v17 = vshrl.u32 %v2041_v6, 16  ;;  %v2339_v24 = vld [vmem:[#allocation11 + $0x74] ss:$8 sps:$4 sm:$0xff]   ;;  %v2337_v39 = vld [vmem:[#allocation11 + $0x70] ss:$8 sps:$4 sm:$0xff]   ;;  %v2662_v49 = vld [vmem:[#allocation5 + $0x20] sm:$0xff] }
  0x51   :  { %644 = vmatpush1.bf16.msra.mxu0 %v2296_v28  ;;  %v219_v18 = vshll.u32 %v2041_v6, 16  ;;  %v307_v21 = vcombine.high %v306_v11, %v306_v11  ;;  %v223_v22 = vshrl.u32 %v2042_v7, 16  ;;  %v226_v23 = vshll.u32 %v2042_v7, 16  ;;  %v125_v30 = vld [vmem:[#allocation2 + $0x4] sm:$0x1]  ;;  %v2666_v58 = vld [vmem:[#allocation5 + $0x28] sm:$0xff] }
  0x52   :  { %903 = vmatpush1.bf16.msra.mxu1 %v2266_v19  ;;  %645 = vmatprep.subr.bf16.mxu0 %v2300_v29  ;;  %v169_v19 = vld [vmem:[#allocation2] sm:$0x1]  ;;  %v218_v27 = vrot.slane %v216_v17, 7  ;;  %v315_v28 = vcombine.high %v314_v12, %v314_v12  ;;  %v331_v29 = vcombine.high %v330_v13, %v330_v13  ;;  %v2303_v41 = vld [vmem:[#allocation10 + $0xb4] ss:$8 sps:$4 sm:$0xff]   ;;  %v126_v57 = vsel %vm2611_vm2, 0, %v125_v30 }
  0x53   :  { %904 = vmatprep.subr.bf16.mxu1 %v2267_v20  ;;  %v291_v20 = vcombine.high %v290_v10, %v290_v10  ;;  %v462_v42 = vld [vmem:[#allocation2 + $0x1] sm:$0x1]  ;;  %127 = vst [vmem:[#allocation2 + $0x4] sm:$0x1] %v126_v57  ;;  %v2340_v4 = vld [vmem:[#allocation11 + $0x60] ss:$8 sps:$4 sm:$0xff]   ;;  %v2043_v12 = vcombine.high %v2662_v49, %v2662_v49  ;;  %v2044_v13 = vcombine.high %v2666_v58, %v2666_v58 }
  0x54   :  { %v221_v46 = vor.u32 %v219_v18, %v218_v27  ;;  %v322_v47 = vrot.slane %v315_v28, %v2618_v40  ;;  %v338_v48 = vrot.slane %v331_v29, %v2618_v40  ;;  %v2305_v62 = vld [vmem:[#allocation10 + $0xb0] ss:$8 sps:$4 sm:$0xff]   ;;  %v2309_v5 = vld [vmem:[#allocation10 + $0xa4] ss:$8 sps:$4 sm:$0xff]   ;;  %v131_v10 = vld [vmem:[#allocation2 + $0x6] sm:$0x1] }
  0x55   :  { %646 = vmatpush1.bf16.msra.mxu0 %v2302_v36  ;;  %v410_v36 = vshrl.u32 %v307_v21, 16  ;;  %v171_v52 = vld [vmem:[#allocation2 + $0x2] sm:$0x1]  ;;  %v172_v53 = vld [vmem:[#allocation2 + $0x3] sm:$0x1]  ;;  %v2689_v27 = vld [vmem:[#allocation5 + $0x38] sm:$0xff] }
  0x56   :  { %905 = vmatpush1.bf16.msra.mxu1 %v2269_v25  ;;  %647 = vmatprep.subr.bf16.mxu0 %v2306_v38  ;;  %v170_v25 = vld [vmem:[#allocation2 + $0x1] sm:$0x1]  ;;  %v128_v38 = vld [vmem:[#allocation2 + $0x5] sm:$0x1]  ;;  %v323_v55 = vcombine.high %v322_v47, %v322_v47  ;;  %v339_v56 = vcombine.high %v338_v48, %v338_v48  ;;  %v270_v2 = vsel %vm2611_vm2, %v171_v52, %v221_v46  ;;  %v468_v11 = vld [vmem:[#allocation2 + $0x3] sm:$0x1] }
  0x57   :  { %906 = vmatprep.subr.bf16.mxu1 %v2273_v26  ;;  %v268_v26 = vsel %vm2611_vm2, %v169_v19, %v207_v15  ;;  %v2056_v51 = vrot.slane %v410_v36, 9  ;;  %v362_v15 = vrot.slane %v2666_v58, %v2618_v40  ;;  %v2311_v21 = vld [vmem:[#allocation10 + $0xa0] ss:$8 sps:$4 sm:$0xff]   ;;  %v2317_v48 = vld [vmem:[#allocation10 + $0x90] ss:$8 sps:$4 sm:$0xff]   ;;  %v2046_v52 = vcombine.high %v2689_v27, %v2689_v27  ;;  %s2028_s22 = sshll.u32 %s2524_s21, 4  ;;  %s2029_s22 = int_to_ptr.vmem [resolvable:$true] %s2028_s22 }
  0x58   :  { %v415_v6 = vshrl.u32 %v323_v55, 16  ;;  %v420_v7 = vshrl.u32 %v339_v56, 16  ;;  %v2320_v55 = vld [vmem:[#allocation10 + $0x84] ss:$8 sps:$4 sm:$0xff]   ;;  %v1937_v32 = vld [vmem:[#allocation13 + $0x50] sm:$0xff]  ;;  %vm1821_vm11 = vcmask 1042434   ;;  %p2490_p12 = scmp.lt.s32.totalorder %s2029_s22, %s2029_s22 }
  0x59   :  { %648 = vmatpush1.bf16.msra.mxu0 %v2308_v45  ;;  %v463_v1 = vsel %vm2611_vm2, %v2056_v51, %v462_v42  ;;  %vm1823_vm12 = vcmask 1043459   ;;  %vm1825_vm13 = vcmask 1044484   ;;  %vm1827_vm14 = vcmask 1045509   ;;  %s2485_s23 = scalar_lea.vmem %s2029_s22, 128 }
  0x5a   :  { %907 = vmatpush1.bf16.msra.mxu1 %v2275_v31  ;;  %649 = vmatprep.subr.bf16.mxu0 %v2312_v50  ;;  %v2299_v31 = vld [vmem:[#allocation10 + $0xc0] ss:$8 sps:$4 sm:$0xff]   ;;  %464 = vst [vmem:[#allocation2 + $0x1] sm:$0x1] %v463_v1  ;;  %v2057_v17 = vrot.slane %v415_v6, 9  ;;  %v2058_v18 = vrot.slane %v420_v7, 9  ;;  %p2486_p11 = scmp.ne.s32.totalorder %s2029_s22, %s2485_s23  ;;  %p2491_p13 = scmp.lt.s32.totalorder %s2485_s23, %s2485_s23 }
  0x5b   :  { %908 = vmatprep.subr.bf16.mxu1 %v2279_v33  ;;  %v269_v33 = vsel %vm2611_vm2, %v170_v25, %v214_v16  ;;  %v2345_v16 = vld [vmem:[#allocation11 + $0x54] ss:$8 sps:$4 sm:$0xff]   ;;  %v240_v25 = vshll.u32 %v2044_v13, 16  ;;  %v251_v6 = vshrl.u32 %v2046_v52, 16  ;;  %v254_v7 = vshll.u32 %v2046_v52, 16 }
  0x5c   :  { %v2063_v45 = vcombine.low %v268_v26, %v269_v33  ;;  %v2687_v26 = vld [vmem:[#allocation5 + $0x30] sm:$0xff]  ;;  %v469_v29 = vsel %vm2611_vm2, %v2058_v18, %v468_v11  ;;  %vm1829_vm15 = vcmask 1046534   ;;  %vm1831_vm0 = vcmask 1047559   ;;  %p2492_p0 = por %p2491_p13, %p2490_p12 }
  0x5d   :  { %650 = vmatpush1.bf16.msra.mxu0 %v2314_v9  ;;  %v129_v9 = vsel %vm2611_vm2, 0, %v128_v38  ;;  %v2343_v33 = vld [vmem:[#allocation11 + $0x50] ss:$8 sps:$4 sm:$0xff]   ;;  %470 = vst [vmem:[#allocation2 + $0x3] sm:$0x1] %v469_v29  ;;  %v2045_v47 = vcombine.high %v2687_v26, %v2687_v26 }
  0x5e   :  { %909 = vmatpush2.bf16.msra.mxu1 %v2281_v35  ;;  %v405_v35 = vshrl.u32 %v291_v20, 16  ;;  %1572 = vmatprep.subr.bf16.mxu0 %v2339_v24  ;;  %130 = vst [vmem:[#allocation2 + $0x5] sm:$0x1] %v129_v9  ;;  %v134_v20 = vld [vmem:[#allocation2 + $0x7] sm:$0x1]  ;;  %v237_v24 = vshrl.u32 %v2044_v13, 16  ;;  %p2493_p1 = pnand %p2492_p0, %p2486_p11 }
  0x5f   :  { %910 = vmatprep.subr.bf16.mxu1 %v2285_v37  ;;  %v225_v37 = vrot.slane %v223_v22, 7  ;;  %v230_v22 = vshrl.u32 %v2043_v12, 16  ;;  %v135_v38 = vsel %vm2611_vm2, 0, %v134_v20  ;;  %v173_v42 = vld [vmem:[#allocation2 + $0x4] sm:$0x1] }
  0x60   :  { %v2055_v50 = vrot.slane %v405_v35, 9  ;;  %668 = vmatmul.mubr.bf16.vlgmr.msra.gmra.mxu0 %v2063_v45  ;;  %v239_v36 = vrot.slane %v237_v24, 7  ;;  %136 = vst [vmem:[#allocation2 + $0x7] sm:$0x1] %v135_v38  ;;  %v2351_v1 = vld [vmem:[#allocation11 + $0x34] ss:$8 sps:$4 sm:$0xff]   ;;  %v2086_v38 = vcombine.high %v2638_v59, %v2640_v60 }
  0x61   :  { %v228_v54 = vor.u32 %v226_v23, %v225_v37  ;;  %677 = vmatprep.mubr.bf16.mxu0 %v2520_v0  ;;  %1573 = vmatpush1.bf16.msra.mxu0 %v2337_v39  ;;  %v233_v23 = vshll.u32 %v2043_v12, 16  ;;  %v232_v35 = vrot.slane %v230_v22, 7  ;;  %v132_v37 = vsel %vm2611_vm2, 0, %v131_v10  ;;  %v2348_v39 = vld [vmem:[#allocation11 + $0x44] ss:$8 sps:$4 sm:$0xff]  }
  0x62   :  { %911 = vmatpush2.bf16.msra.mxu1 %v2287_v61  ;;  %v2342_v61 = vld [vmem:[#allocation11 + $0x64] ss:$8 sps:$4 sm:$0xff]   ;;  %v460_v63 = vsel %vm2611_vm2, %v2055_v50, %v169_v19  ;;  %133 = vst [vmem:[#allocation2 + $0x6] sm:$0x1] %v132_v37  ;;  %v242_v51 = vor.u32 %v240_v25, %v239_v36  ;;  %v2349_v12 = vld [vmem:[#allocation11 + $0x30] ss:$8 sps:$4 sm:$0xff]   ;;  %v2083_v36 = vcombine.low %v2622_v43, %v2624_v44 }
  0x63   :  { %912 = vmatprep.subr.bf16.mxu1 %v2291_v3  ;;  %v271_v3 = vsel %vm2611_vm2, %v172_v53, %v228_v54  ;;  %461 = vst [vmem:[#allocation2] sm:$0x1] %v460_v63  ;;  %1574 = vmatprep.subr.bf16.mxu0 %v2342_v61  ;;  %v235_v50 = vor.u32 %v233_v23, %v232_v35  ;;  %v2346_v54 = vld [vmem:[#allocation11 + $0x40] ss:$8 sps:$4 sm:$0xff]   ;;  %v247_v63 = vshll.u32 %v2045_v47, 16 }
  0x64   :  { %v2064_v19 = vcombine.low %v270_v2, %v271_v3  ;;  %v378_v53 = vrot.slane %v2687_v26, %v2618_v40  ;;  %v2322_v13 = vld [vmem:[#allocation10 + $0x80] ss:$8 sps:$4 sm:$0xff]   ;;  %v2354_v25 = vld [vmem:[#allocation11 + $0x24] ss:$8 sps:$4 sm:$0xff]  }
  0x65   :  { %1575 = vmatpush1.bf16.msra.mxu0 %v2340_v4  ;;  %v174_v56 = vld [vmem:[#allocation2 + $0x5] sm:$0x1]  ;;  %v272_v2 = vsel %vm2611_vm2, %v173_v42, %v235_v50  ;;  %v471_v4 = vld [vmem:[#allocation2 + $0x4] sm:$0x1]  ;;  %v2352_v37 = vld [vmem:[#allocation11 + $0x20] ss:$8 sps:$4 sm:$0xff]  }
  0x66   :  { %913 = vmatpush2.bf16.msra.mxu1 %v2293_v8  ;;  %v465_v8 = vld [vmem:[#allocation2 + $0x2] sm:$0x1]  ;;  %1576 = vmatprep.subr.bf16.mxu0 %v2345_v16  ;;  %v273_v3 = vsel %vm2611_vm2, %v174_v56, %v242_v51  ;;  %v394_v16 = vrot.slane %v2689_v27, %v2618_v40  ;;  %v2360_v51 = vld [vmem:[#allocation11 + $0x4] ss:$8 sps:$4 sm:$0xff]   ;;  %v2087_v56 = vcombine.low %v2662_v49, %v2666_v58 }
  0x67   :  { %914 = vmatprep.subr.bf16.mxu1 %v2297_v14  ;;  %v346_v14 = vrot.slane %v2662_v49, %v2618_v40  ;;  %v466_v28 = vsel %vm2611_vm2, %v2057_v17, %v465_v8  ;;  %v2065_v10 = vcombine.low %v272_v2, %v273_v3  ;;  %v2355_v50 = vld [vmem:[#allocation11 + $0x10] ss:$8 sps:$4 sm:$0xff]   ;;  %v2375_v3 = vld [vmem:[#allocation11 + $0xb4] ss:$8 sps:$4 sm:$0xff]  }
  0x68   :  { %467 = vst [vmem:[#allocation2 + $0x2] sm:$0x1] %v466_v28  ;;  %678 = vmatmul.mubr.bf16.gmra.mxu0 %v2064_v19  ;;  %v395_v24 = vcombine.high %v394_v16, %v394_v16  ;;  %v2367_v2 = vld [vmem:[#allocation11 + $0xd0] ss:$8 sps:$4 sm:$0xff]  }
  0x69   :  { %v347_v30 = vcombine.high %v346_v14, %v346_v14  ;;  %687 = vmatprep.mubr.bf16.mxu0 %v2520_v0  ;;  %1577 = vmatpush1.bf16.msra.mxu0 %v2343_v33  ;;  %v253_v14 = vrot.slane %v251_v6, 7  ;;  %v175_v20 = vld [vmem:[#allocation2 + $0x6] sm:$0x1]  ;;  %v2376_v6 = vld [vmem:[#allocation11 + $0xa0] ss:$8 sps:$4 sm:$0xff]  }
  0x6a   :  { %915 = vmatpush2.bf16.msra.mxu1 %v2299_v31  ;;  %v363_v31 = vcombine.high %v362_v15, %v362_v15  ;;  %1578 = vmatprep.subr.bf16.mxu0 %v2348_v39  ;;  %v379_v15 = vcombine.high %v378_v53, %v378_v53  ;;  %v402_v35 = vrot.slane %v395_v24, %v2618_v40  ;;  %v477_v42 = vld [vmem:[#allocation2 + $0x6] sm:$0x1] }
  0x6b   :  { %916 = vmatprep.subr.bf16.mxu1 %v2303_v41  ;;  %v2315_v41 = vld [vmem:[#allocation10 + $0x94] ss:$8 sps:$4 sm:$0xff]   ;;  %v354_v45 = vrot.slane %v347_v30, %v2618_v40  ;;  %v256_v22 = vor.u32 %v254_v7, %v253_v14  ;;  %v2085_v53 = vcombine.low %v2638_v59, %v2640_v60  ;;  %v2089_v59 = vcombine.low %v2687_v26, %v2689_v27  ;;  %v2361_v60 = vld [vmem:[#allocation11 + $0xf0] ss:$8 sps:$4 sm:$0xff]   ;;  %v2382_v14 = vld [vmem:[#allocation11 + $0x80] ss:$8 sps:$4 sm:$0xff]  }
  0x6c   :  { %v370_v46 = vrot.slane %v363_v31, %v2618_v40  ;;  %v386_v23 = vrot.slane %v379_v15, %v2618_v40  ;;  %v403_v39 = vcombine.high %v402_v35, %v402_v35  ;;  %v140_v7 = vld [vmem:[#allocation3 + $0x1] sm:$0x1]  ;;  %v146_v15 = vld [vmem:[#allocation3 + $0x3] sm:$0x1] }
  0x6d   :  { %v355_v57 = vcombine.high %v354_v45, %v354_v45  ;;  %1579 = vmatpush1.bf16.msra.mxu0 %v2346_v54  ;;  %v2358_v54 = vld [vmem:[#allocation11] ss:$8 sps:$4 sm:$0xff]   ;;  %v147_v16 = vsel %vm2611_vm2, 0, %v146_v15 }
  0x6e   :  { %917 = vmatpush2.bf16.msra.mxu1 %v2305_v62  ;;  %v371_v61 = vcombine.high %v370_v46, %v370_v46  ;;  %v244_v62 = vshrl.u32 %v2045_v47, 16  ;;  %1580 = vmatprep.subr.bf16.mxu0 %v2351_v1  ;;  %v387_v33 = vcombine.high %v386_v23, %v386_v23  ;;  %v440_v46 = vshrl.u32 %v403_v39, 16  ;;  %v2369_v1 = vld [vmem:[#allocation11 + $0xd4] ss:$8 sps:$4 sm:$0xff]   ;;  %148 = vst [vmem:[#allocation3 + $0x3] sm:$0x1] %v147_v16 }
  0x6f   :  { %918 = vmatprep.subr.bf16.mxu1 %v2309_v5  ;;  %v474_v5 = vld [vmem:[#allocation2 + $0x5] sm:$0x1]  ;;  %v425_v8 = vshrl.u32 %v355_v57, 16  ;;  %v2090_v57 = vcombine.high %v2687_v26, %v2689_v27  ;;  %v137_v26 = vld [vmem:[#allocation3] sm:$0x1] }
  0x70   :  { %v430_v9 = vshrl.u32 %v371_v61, 16  ;;  %v246_v11 = vrot.slane %v244_v62, 7  ;;  %688 = vmatmul.mubr.bf16.gmra.mxu0 %v2065_v10  ;;  %v2062_v43 = vrot.slane %v440_v46, 9  ;;  %v2363_v61 = vld [vmem:[#allocation11 + $0xf4] ss:$8 sps:$4 sm:$0xff]  }
  0x71   :  { %v2059_v17 = vrot.slane %v425_v8, 9  ;;  %697 = vmatprep.mubr.bf16.mxu0 %v2520_v0  ;;  %1581 = vmatpush1.bf16.msra.mxu0 %v2349_v12  ;;  %v435_v0 = vshrl.u32 %v387_v33, 16  ;;  %v2366_v62 = vld [vmem:[#allocation11 + $0xe4] ss:$8 sps:$4 sm:$0xff]   ;;  %v141_v8 = vsel %vm2611_vm2, 0, %v140_v7 }
  0x72   :  { %919 = vmatpush2.bf16.msra.mxu1 %v2311_v21  ;;  %v2060_v18 = vrot.slane %v430_v9, 9  ;;  %v249_v19 = vor.u32 %v247_v63, %v246_v11  ;;  %v176_v21 = vld [vmem:[#allocation2 + $0x7] sm:$0x1]  ;;  %1582 = vmatprep.subr.bf16.mxu0 %v2354_v25  ;;  %v2364_v63 = vld [vmem:[#allocation11 + $0xe0] ss:$8 sps:$4 sm:$0xff]  }
  0x73   :  { %920 = vmatprep.subr.bf16.mxu1 %v2315_v41  ;;  %v472_v28 = vsel %vm2611_vm2, %v2059_v17, %v471_v4  ;;  %v275_v31 = vsel %vm2611_vm2, %v176_v21, %v256_v22  ;;  %v2357_v41 = vld [vmem:[#allocation11 + $0x14] ss:$8 sps:$4 sm:$0xff]   ;;  %v2061_v47 = vrot.slane %v435_v0, 9  ;;  %v2373_v4 = vld [vmem:[#allocation11 + $0xb0] ss:$8 sps:$4 sm:$0xff]  }
  0x74   :  { %v475_v29 = vsel %vm2611_vm2, %v2060_v18, %v474_v5  ;;  %473 = vst [vmem:[#allocation2 + $0x4] sm:$0x1] %v472_v28  ;;  %v274_v30 = vsel %vm2611_vm2, %v175_v20, %v249_v19  ;;  %v2378_v27 = vld [vmem:[#allocation11 + $0xa4] ss:$8 sps:$4 sm:$0xff]   ;;  %v138_v5 = vsel %vm2611_vm2, 0, %v137_v26 }
  0x75   :  { %476 = vst [vmem:[#allocation2 + $0x5] sm:$0x1] %v475_v29  ;;  %v2066_v45 = vcombine.low %v274_v30, %v275_v31  ;;  %1583 = vmatpush1.bf16.msra.mxu0 %v2352_v37  ;;  %v478_v44 = vsel %vm2611_vm2, %v2061_v47, %v477_v42  ;;  %139 = vst [vmem:[#allocation3] sm:$0x1] %v138_v5  ;;  %v2381_v9 = vld [vmem:[#allocation11 + $0x94] ss:$8 sps:$4 sm:$0xff]  }
  0x76   :  { %921 = vmatpush2.bf16.msra.mxu1 %v2317_v48  ;;  %v480_v48 = vld [vmem:[#allocation2 + $0x7] sm:$0x1]  ;;  %1584 = vmatprep.subr.bf16.mxu0 %v2357_v41  ;;  %479 = vst [vmem:[#allocation2 + $0x6] sm:$0x1] %v478_v44  ;;  %142 = vst [vmem:[#allocation3 + $0x1] sm:$0x1] %v141_v8 }
  0x77   :  { %922 = vmatprep.subr.bf16.mxu1 %v2320_v55  ;;  %v481_v52 = vsel %vm2611_vm2, %v2062_v43, %v480_v48  ;;  %v2088_v55 = vcombine.high %v2662_v49, %v2666_v58  ;;  %v2372_v49 = vld [vmem:[#allocation11 + $0xc4] ss:$8 sps:$4 sm:$0xff]   ;;  %v2370_v58 = vld [vmem:[#allocation11 + $0xc0] ss:$8 sps:$4 sm:$0xff]   ;;  %v2379_v10 = vld [vmem:[#allocation11 + $0x90] ss:$8 sps:$4 sm:$0xff]  }
  0x78   :  { %698 = vmatmul.mubr.bf16.gmra.mxu0 %v2066_v45  ;;  %482 = vst [vmem:[#allocation2 + $0x7] sm:$0x1] %v481_v52  ;;  %v143_v11 = vld [vmem:[#allocation3 + $0x2] sm:$0x1]  ;;  %v149_v17 = vld [vmem:[#allocation3 + $0x4] sm:$0x1] }
  0x79   :  { %1585 = vmatpush1.bf16.msra.mxu0 %v2355_v50  ;;  %v144_v12 = vsel %vm2611_vm2, 0, %v143_v11  ;;  %v150_v18 = vsel %vm2611_vm2, 0, %v149_v17  ;;  %v152_v19 = vld [vmem:[#allocation3 + $0x5] sm:$0x1]  ;;  %v155_v21 = vld [vmem:[#allocation3 + $0x6] sm:$0x1] }
  0x7a   :  { %923 = vmatpush2.bf16.msra.mxu1 %v2322_v13  ;;  %1586 = vmatprep.subr.bf16.mxu0 %v2360_v51  ;;  %145 = vst [vmem:[#allocation3 + $0x2] sm:$0x1] %v144_v12  ;;  %v2384_v13 = vld [vmem:[#allocation11 + $0x84] ss:$8 sps:$4 sm:$0xff]   ;;  %151 = vst [vmem:[#allocation3 + $0x4] sm:$0x1] %v150_v18 }
  0x7b   :  { %v153_v20 = vsel %vm2611_vm2, 0, %v152_v19  ;;  %v156_v22 = vsel %vm2611_vm2, 0, %v155_v21  ;;  %v158_v23 = vld [vmem:[#allocation3 + $0x7] sm:$0x1]  ;;  %v965_v37 = vld [vmem:[%s2972_s3] sm:$0x3] }
  0x7c   :  { %154 = vst [vmem:[#allocation3 + $0x5] sm:$0x1] %v153_v20  ;;  %157 = vst [vmem:[#allocation3 + $0x6] sm:$0x1] %v156_v22  ;;  %v159_v24 = vsel %vm2611_vm2, 0, %v158_v23 }
  0x7d   :  { %925 = vmatmul.mubr.bf16.vlgmr.msra.gmra.mxu1 %v2083_v36  ;;  %1587 = vmatpush1.bf16.msra.mxu0 %v2358_v54  ;;  %160 = vst [vmem:[#allocation3 + $0x7] sm:$0x1] %v159_v24  ;;  %v2760_v36 = vsub.s32 0, %v2615_v34  ;;  %v993_v41 = vld [vmem:[%s2973_s4] sm:$0x3] }
  0x7e   :  { %934 = vmatprep.mubr.bf16.mxu1 %v2086_v38  ;;  %1588 = vmatprep.subr.bf16.mxu0 %v2363_v61  ;;  %v2766_v38 = vsub.s32 1, %v2615_v34 }
  0x7f   :  { %v2769_v0 = vrot.slane %v965_v37, %v2760_v36  ;;  %v2778_v47 = vrot.slane %v993_v41, %v2760_v36 }
  0x80   :  { %v2775_v46 = vrot.slane %v965_v37, %v2766_v38  ;;  %v2782_v51 = vrot.slane %v993_v41, %v2766_v38 }
  0x81   :  { %1589 = vmatpush2.bf16.msra.mxu0 %v2361_v60 }
  0x82   :  { %1590 = vmatprep.subr.bf16.mxu0 %v2366_v62 }
  0x85   :  { %935 = vmatmul.mubr.bf16.gmra.mxu1 %v2085_v53  ;;  %1591 = vmatpush2.bf16.msra.mxu0 %v2364_v63 }
  0x86   :  { %944 = vmatprep.mubr.bf16.mxu1 %v2088_v55  ;;  %1592 = vmatprep.subr.bf16.mxu0 %v2369_v1 }
  0x89   :  { %1593 = vmatpush2.bf16.msra.mxu0 %v2367_v2 }
  0x8a   :  { %1594 = vmatprep.subr.bf16.mxu0 %v2372_v49 }
  0x8d   :  { %945 = vmatmul.mubr.bf16.gmra.mxu1 %v2087_v56  ;;  %1595 = vmatpush2.bf16.msra.mxu0 %v2370_v58 }
  0x8e   :  { %954 = vmatprep.mubr.bf16.mxu1 %v2090_v57  ;;  %1596 = vmatprep.subr.bf16.mxu0 %v2375_v3 }
  0x91   :  { %1597 = vmatpush2.bf16.msra.mxu0 %v2373_v4 }
  0x92   :  { %1598 = vmatprep.subr.bf16.mxu0 %v2378_v27 }
  0x95   :  { %955 = vmatmul.mubr.bf16.gmra.mxu1 %v2089_v59  ;;  %1599 = vmatpush2.bf16.msra.mxu0 %v2376_v6 }
  0x96   :  { %1600 = vmatprep.subr.bf16.mxu0 %v2381_v9 }
  0x99   :  { %1601 = vmatpush2.bf16.msra.mxu0 %v2379_v10 }
  0x9a   :  { %1602 = vmatprep.subr.bf16.mxu0 %v2384_v13 }
  0x9d   :  { %1603 = vmatpush2.bf16.msra.mxu0 %v2382_v14 }
 0x120   :  { %v669_v25 = vpop.f32.mrf.mxu0 }
 0x122   :  { %v671_v28 = vpop.f32.mrf.mxu0 }
 0x124   :  { %v673_v29 = vpop.f32.mrf.mxu0 }
 0x126   :  { %v675_v30 = vpop.f32.mrf.mxu0 }
 0x128   :  { %v679_v31 = vpop.f32.mrf.mxu0 }
 0x12a   :  { %v681_v33 = vpop.f32.mrf.mxu0 }
 0x12c   :  { %v683_v35 = vpop.f32.mrf.mxu0 }
 0x12e   :  { %v685_v39 = vpop.f32.mrf.mxu0 }
 0x130   :  { %v689_v50 = vpop.f32.mrf.mxu0 }
 0x132   :  { %v691_v57 = vpop.f32.mrf.mxu0 }
 0x134   :  { %v693_v4 = vpop.f32.mrf.mxu0 }
 0x136   :  { %v695_v14 = vpop.f32.mrf.mxu0 }
 0x13d   :  { %v926_v42 = vpop.f32.mrf.mxu1 }
 0x13e   :  { %v927_v45 = vadd.f32 %v926_v42, %v669_v25 }
 0x13f   :  { %v928_v48 = vpop.f32.mrf.mxu1 }
 0x140   :  { %v977_v43 = vmul.f32 %v2769_v0, %v927_v45  ;;  %v929_v44 = vadd.f32 %v928_v48, %v671_v28 }
 0x141   :  { %v930_v52 = vpop.f32.mrf.mxu1 }
 0x142   :  { %v978_v53 = vmul.f32 %v2775_v46, %v929_v44  ;;  %v931_v54 = vadd.f32 %v930_v52, %v673_v29  ;;  %v1005_v55 = vadd.f32 %v2778_v47, %v977_v43 }
 0x143   :  { %v932_v56 = vpop.f32.mrf.mxu1 }
 0x144   :  { %v1006_v59 = vadd.f32 %v2782_v51, %v978_v53  ;;  %v979_v60 = vmul.f32 %v2769_v0, %v931_v54  ;;  %v933_v61 = vadd.f32 %v932_v56, %v675_v30  ;;  %v1021_v49 = vmax.f32 %v1005_v55, 0.0  ;;  %v699_v30 = vpop.f32.mrf.mxu0  ;;  %v1069_v54 = vld [vmem:[#allocation3] sm:$0x1] }
 0x145   :  { %v936_v62 = vpop.f32.mrf.mxu1 }
 0x146   :  { %v1022_v63 = vmax.f32 %v1006_v59, 0.0  ;;  %v980_v1 = vmul.f32 %v2775_v46, %v933_v61  ;;  %v937_v2 = vadd.f32 %v936_v62, %v679_v31  ;;  %v1007_v58 = vadd.f32 %v2778_v47, %v979_v60 }
 0x147   :  { %v938_v3 = vpop.f32.mrf.mxu1 }
 0x148   :  { %v1008_v26 = vadd.f32 %v2782_v51, %v980_v1  ;;  %v981_v27 = vmul.f32 %v2769_v0, %v937_v2  ;;  %v939_v5 = vadd.f32 %v938_v3, %v681_v33  ;;  %v1037_v7 = vmax.f32 %v1021_v49, %v1022_v63 }
 0x149   :  { %v940_v6 = vpop.f32.mrf.mxu1  ;;  %v1023_v12 = vmax.f32 %v1007_v58, 0.0 }
 0x14a   :  { %v1024_v8 = vmax.f32 %v1008_v26, 0.0  ;;  %v1009_v9 = vadd.f32 %v2778_v47, %v981_v27  ;;  %v982_v10 = vmul.f32 %v2775_v46, %v939_v5  ;;  %v941_v11 = vadd.f32 %v940_v6, %v683_v35  ;;  %v1070_v26 = vld [vmem:[#allocation3 + $0x1] sm:$0x1] }
 0x14b   :  { %v942_v13 = vpop.f32.mrf.mxu1  ;;  %v2177_v15 = vpack.c.bf16 %v1037_v7, %v1037_v7 }
 0x14c   :  { %v1010_v16 = vadd.f32 %v2782_v51, %v982_v10  ;;  %v983_v17 = vmul.f32 %v2769_v0, %v941_v11  ;;  %v943_v18 = vadd.f32 %v942_v13, %v685_v39  ;;  %v1025_v19 = vmax.f32 %v1009_v9, 0.0 }
 0x14d   :  { %v946_v20 = vpop.f32.mrf.mxu1  ;;  %v1038_v21 = vmax.f32 %v1023_v12, %v1024_v8  ;;  %v1078_v22 = vshrl.u32 %v2177_v15, 16  ;;  %v1155_v23 = vrot.slane %v2177_v15, %v2618_v40  ;;  %v1081_v29 = vshll.u32 %v2177_v15, 16 }
 0x14e   :  { %v1011_v24 = vadd.f32 %v2778_v47, %v983_v17  ;;  %v984_v25 = vmul.f32 %v2775_v46, %v943_v18  ;;  %v947_v28 = vadd.f32 %v946_v20, %v689_v50  ;;  %v1026_v42 = vmax.f32 %v1010_v16, 0.0 }
 0x14f   :  { %v948_v31 = vpop.f32.mrf.mxu1  ;;  %v1045_v33 = vpack.c.bf16 %v1038_v21, %v1037_v7  ;;  %v2178_v35 = vpack.c.bf16 %v1038_v21, %v1038_v21  ;;  %v1080_v37 = vrot.slane %v1078_v22, 7  ;;  %v1156_v41 = vcombine.high %v1155_v23, %v1155_v23 }
 0x150   :  { %v1012_v39 = vadd.f32 %v2782_v51, %v984_v25  ;;  %v985_v45 = vmul.f32 %v2769_v0, %v947_v28  ;;  %v949_v48 = vadd.f32 %v948_v31, %v691_v57  ;;  %v1027_v43 = vmax.f32 %v1011_v24, 0.0  ;;  %v701_v57 = vpop.f32.mrf.mxu0  ;;  %v1327_v24 = vld [vmem:[#allocation3 + $0x1] sm:$0x1] }
 0x151   :  { %v1083_v44 = vor.u32 %v1081_v29, %v1080_v37  ;;  %v1085_v52 = vshrl.u32 %v2178_v35, 16  ;;  %v1163_v53 = vrot.slane %v1156_v41, %v2618_v40  ;;  %1604 = vmatprep.mubr.bf16.mxu0 %v1045_v33  ;;  %v950_v50 = vpop.f32.mrf.mxu1  ;;  %v1088_v59 = vshll.u32 %v2178_v35, 16 }
 0x152   :  { %v2803_v55 = vadd.f32 %v2778_v47, %v985_v45  ;;  %v986_v56 = vmul.f32 %v2775_v46, %v949_v48  ;;  %v1171_v60 = vrot.slane %v2178_v35, %v2618_v40  ;;  %v1028_v61 = vmax.f32 %v1012_v39, 0.0 }
 0x153   :  { %v1087_v62 = vrot.slane %v1085_v52, 7  ;;  %v1164_v63 = vcombine.high %v1163_v53, %v1163_v53  ;;  %v951_v1 = vadd.f32 %v950_v50, %v693_v4  ;;  %v952_v2 = vpop.f32.mrf.mxu1  ;;  %v1141_v27 = vsel %vm2611_vm2, %v1069_v54, %v1083_v44 }
 0x154   :  { %v2808_v49 = vadd.f32 %v2782_v51, %v986_v56  ;;  %v1172_v58 = vcombine.high %v1171_v60, %v1171_v60  ;;  %v953_v3 = vadd.f32 %v952_v2, %v695_v14  ;;  %v1039_v9 = vmax.f32 %v1025_v19, %v1026_v42  ;;  %v703_v14 = vpop.f32.mrf.mxu0 }
 0x155   :  { %v1090_v5 = vor.u32 %v1088_v59, %v1087_v62  ;;  %v1278_v6 = vshrl.u32 %v1164_v63, 16  ;;  %v987_v7 = vmul.f32 %v2769_v0, %v951_v1  ;;  %v956_v8 = vpop.f32.mrf.mxu1  ;;  %v1029_v10 = vmax.f32 %v2803_v55, 0.0 }
 0x156   :  { %v1179_v4 = vrot.slane %v1172_v58, %v2618_v40  ;;  %v988_v11 = vmul.f32 %v2775_v46, %v953_v3  ;;  %v957_v12 = vadd.f32 %v956_v8, %v699_v30  ;;  %v1040_v18 = vmax.f32 %v1027_v43, %v1028_v61  ;;  %v705_v41 = vpop.f32.mrf.mxu0  ;;  %v1072_v8 = vld [vmem:[#allocation3 + $0x3] sm:$0x1] }
 0x157   :  { %v1015_v13 = vadd.f32 %v2778_v47, %v987_v7  ;;  %v958_v15 = vpop.f32.mrf.mxu1  ;;  %v1142_v16 = vsel %vm2611_vm2, %v1070_v26, %v1090_v5  ;;  %v1325_v17 = vsel %vm2611_vm2, %v1278_v6, %v1069_v54  ;;  %v1030_v23 = vmax.f32 %v2808_v49, 0.0 }
 0x158   :  { %v1180_v20 = vcombine.high %v1179_v4, %v1179_v4  ;;  %v1016_v19 = vadd.f32 %v2782_v51, %v988_v11  ;;  %v989_v21 = vmul.f32 %v2769_v0, %v957_v12  ;;  %v959_v22 = vadd.f32 %v958_v15, %v701_v57  ;;  %1326 = vst [vmem:[#allocation3] sm:$0x1] %v1325_v17  ;;  %v1330_v4 = vld [vmem:[#allocation3 + $0x2] sm:$0x1] }
 0x159   :  { %v1031_v25 = vmax.f32 %v1015_v13, 0.0  ;;  %v960_v28 = vpop.f32.mrf.mxu1  ;;  %v2139_v29 = vcombine.low %v1141_v27, %v1142_v16  ;;  %v2179_v30 = vpack.c.bf16 %v1039_v9, %v1039_v9  ;;  %v1046_v37 = vpack.c.bf16 %v1040_v18, %v1039_v9  ;;  %v1333_v16 = vld [vmem:[#allocation3 + $0x3] sm:$0x1] }
 0x15a   :  { %v1283_v31 = vshrl.u32 %v1180_v20, 16  ;;  %v2825_v33 = vadd.f32 %v2778_v47, %v989_v21  ;;  %v990_v35 = vmul.f32 %v2775_v46, %v959_v22  ;;  %v961_v42 = vadd.f32 %v960_v28, %v703_v14 }
 0x15b   :  { %1605 = vmatmul.mubr.bf16.vlgmr.msra.gmra.mxu0 %v2139_v29  ;;  %v2180_v39 = vpack.c.bf16 %v1040_v18, %v1040_v18  ;;  %v1187_v45 = vrot.slane %v2179_v30, %v2618_v40  ;;  %v962_v48 = vpop.f32.mrf.mxu1  ;;  %v1092_v43 = vshrl.u32 %v2179_v30, 16  ;;  %v1032_v52 = vmax.f32 %v1016_v19, 0.0 }
 0x15c   :  { %v1328_v44 = vsel %vm2611_vm2, %v1283_v31, %v1327_v24  ;;  %v1018_v53 = vadd.f32 %v2782_v51, %v990_v35  ;;  %1614 = vmatprep.mubr.bf16.mxu0 %v1046_v37  ;;  %v963_v50 = vadd.f32 %v962_v48, %v705_v41  ;;  %v991_v54 = vmul.f32 %v2769_v0, %v961_v42  ;;  %v1071_v0 = vld [vmem:[#allocation3 + $0x2] sm:$0x1] }
 0x15d   :  { %1329 = vst [vmem:[#allocation3 + $0x1] sm:$0x1] %v1328_v44  ;;  %v1188_v55 = vcombine.high %v1187_v45, %v1187_v45  ;;  %v1203_v56 = vrot.slane %v2180_v39, %v2618_v40  ;;  %v1094_v59 = vrot.slane %v1092_v43, 7  ;;  %v1033_v60 = vmax.f32 %v2825_v33, 0.0  ;;  %v1073_v33 = vld [vmem:[#allocation3 + $0x4] sm:$0x1] }
 0x15e   :  { %v992_v61 = vmul.f32 %v2775_v46, %v963_v50  ;;  %v1095_v62 = vshll.u32 %v2179_v30, 16  ;;  %v1099_v63 = vshrl.u32 %v2180_v39, 16  ;;  %v1019_v57 = vadd.f32 %v2778_v47, %v991_v54  ;;  %v1074_v43 = vld [vmem:[#allocation3 + $0x5] sm:$0x1] }
 0x15f   :  { %v1195_v1 = vrot.slane %v1188_v55, %v2618_v40  ;;  %v1204_v2 = vcombine.high %v1203_v56, %v1203_v56  ;;  %v1102_v49 = vshll.u32 %v2180_v39, 16  ;;  %v1041_v27 = vmax.f32 %v1029_v10, %v1030_v23 }
 0x160   :  { %v1020_v58 = vadd.f32 %v2782_v51, %v992_v61  ;;  %v1097_v3 = vor.u32 %v1095_v62, %v1094_v59  ;;  %v1101_v26 = vrot.slane %v1099_v63, 7  ;;  %v1034_v5 = vmax.f32 %v1018_v53, 0.0  ;;  %v1336_v59 = vld [vmem:[#allocation3 + $0x4] sm:$0x1] }
 0x161   :  { %v1196_v6 = vcombine.high %v1195_v1, %v1195_v1  ;;  %v1211_v7 = vrot.slane %v1204_v2, %v2618_v40  ;;  %v1042_v46 = vmax.f32 %v1031_v25, %v1032_v52  ;;  %v1035_v9 = vmax.f32 %v1019_v57, 0.0  ;;  %v1339_v57 = vld [vmem:[#allocation3 + $0x5] sm:$0x1] }
 0x162   :  { %v1036_v11 = vmax.f32 %v1020_v58, 0.0  ;;  %v1104_v47 = vor.u32 %v1102_v49, %v1101_v26  ;;  %v2181_v12 = vpack.c.bf16 %v1041_v27, %v1041_v27  ;;  %v1143_v51 = vsel %vm2611_vm2, %v1071_v0, %v1097_v3 }
 0x163   :  { %v1212_v13 = vcombine.high %v1211_v7, %v1211_v7  ;;  %v1288_v14 = vshrl.u32 %v1196_v6, 16  ;;  %v2182_v15 = vpack.c.bf16 %v1042_v46, %v1042_v46  ;;  %v1047_v17 = vpack.c.bf16 %v1042_v46, %v1041_v27 }
 0x164   :  { %v1144_v10 = vsel %vm2611_vm2, %v1072_v8, %v1104_v47  ;;  %v1219_v18 = vrot.slane %v2181_v12, %v2618_v40  ;;  %v1106_v20 = vshrl.u32 %v2181_v12, 16  ;;  %v1109_v28 = vshll.u32 %v2181_v12, 16 }
 0x165   :  { %v1293_v19 = vshrl.u32 %v1212_v13, 16  ;;  %v1331_v21 = vsel %vm2611_vm2, %v1288_v14, %v1330_v4  ;;  %v2140_v22 = vcombine.low %v1143_v51, %v1144_v10  ;;  %v1235_v23 = vrot.slane %v2182_v15, %v2618_v40  ;;  %v1075_v4 = vld [vmem:[#allocation3 + $0x6] sm:$0x1] }
 0x166   :  { %1332 = vst [vmem:[#allocation3 + $0x2] sm:$0x1] %v1331_v21  ;;  %v1220_v24 = vcombine.high %v1219_v18, %v1219_v18  ;;  %v1108_v25 = vrot.slane %v1106_v20, 7  ;;  %v1113_v29 = vshrl.u32 %v2182_v15, 16  ;;  %v1043_v35 = vmax.f32 %v1033_v60, %v1034_v5  ;;  %v1342_v51 = vld [vmem:[#allocation3 + $0x6] sm:$0x1] }
 0x167   :  { %v1334_v30 = vsel %vm2611_vm2, %v1293_v19, %v1333_v16  ;;  %1615 = vmatmul.mubr.bf16.gmra.mxu0 %v2140_v22  ;;  %v1236_v31 = vcombine.high %v1235_v23, %v1235_v23  ;;  %v1044_v37 = vmax.f32 %v1035_v9, %v1036_v11  ;;  %v1116_v45 = vshll.u32 %v2182_v15, 16  ;;  %v1076_v11 = vld [vmem:[#allocation3 + $0x7] sm:$0x1]  ;;  %v1941_v23 = vld [vmem:[#allocation13 + $0x70] sm:$0xff] }
 0x168   :  { %1335 = vst [vmem:[#allocation3 + $0x3] sm:$0x1] %v1334_v30  ;;  %v1227_v41 = vrot.slane %v1220_v24, %v2618_v40  ;;  %1624 = vmatprep.mubr.bf16.mxu0 %v1047_v17  ;;  %v1111_v42 = vor.u32 %v1109_v28, %v1108_v25  ;;  %v1115_v39 = vrot.slane %v1113_v29, 7  ;;  %v2183_v44 = vpack.c.bf16 %v1043_v35, %v1043_v35  ;;  %v1345_v15 = vld [vmem:[#allocation3 + $0x7] sm:$0x1]  ;;  %v1940_v24 = vld [vmem:[#allocation13 + $0x68] sm:$0xff] }
 0x169   :  { %v1243_v48 = vrot.slane %v1236_v31, %v2618_v40  ;;  %v2184_v52 = vpack.c.bf16 %v1044_v37, %v1044_v37  ;;  %v1048_v55 = vpack.c.bf16 %v1044_v37, %v1043_v35  ;;  %v2522_v21 = vmov 0.0   ;;  %v1942_v22 = vld [vmem:[#allocation13 + $0x78] sm:$0xff]  ;;  %v1939_v25 = vld [vmem:[#allocation13 + $0x60] sm:$0xff]  ;;  %v1936_v29 = vld [vmem:[#allocation13 + $0x48] sm:$0xff] }
 0x16a   :  { %v1228_v53 = vcombine.high %v1227_v41, %v1227_v41  ;;  %v1118_v50 = vor.u32 %v1116_v45, %v1115_v39  ;;  %v1145_v54 = vsel %vm2611_vm2, %v1073_v33, %v1111_v42  ;;  %v1251_v60 = vrot.slane %v2183_v44, %v2618_v40  ;;  %2202 = vmatprep.subr.mxu1 %v2522_v21  ;;  %v1938_v28 = vld [vmem:[#allocation13 + $0x58] sm:$0xff]  ;;  %v1935_v30 = vld [vmem:[#allocation13 + $0x40] sm:$0xff]  ;;  %v1933_v33 = vld [vmem:[#allocation13 + $0x30] sm:$0xff] }
 0x16b   :  { %v1244_v56 = vcombine.high %v1243_v48, %v1243_v48  ;;  %v1267_v61 = vrot.slane %v2184_v52, %v2618_v40  ;;  %v1120_v62 = vshrl.u32 %v2183_v44, 16  ;;  %v1123_v2 = vshll.u32 %v2183_v44, 16  ;;  %2203 = vmatpush3.msra.mxu1 %v1942_v22  ;;  %v1934_v31 = vld [vmem:[#allocation13 + $0x38] sm:$0xff]  ;;  %v1932_v35 = vld [vmem:[#allocation13 + $0x28] sm:$0xff]  ;;  %v1931_v37 = vld [vmem:[#allocation13 + $0x20] sm:$0xff]  ;;  %2234 = vmatprep.mubr.msk.f32.mxu1 %vm2523_vm3, %v2522_v21 }
 0x16c   :  { %v1298_v63 = vshrl.u32 %v1228_v53, 16  ;;  %v1146_v1 = vsel %vm2611_vm2, %v1074_v43, %v1118_v50  ;;  %v1127_v49 = vshrl.u32 %v2184_v52, 16  ;;  %v1252_v3 = vcombine.high %v1251_v60, %v1251_v60  ;;  %2204 = vmatprep.subr.mxu1 %v2522_v21  ;;  %v1930_v41 = vld [vmem:[#allocation13 + $0x18] sm:$0xff]  ;;  %v1929_v42 = vld [vmem:[#allocation13 + $0x10] sm:$0xff]  ;;  %v1928_v39 = vld [vmem:[#allocation13 + $0x8] sm:$0xff] }
 0x16d   :  { %v1303_v58 = vshrl.u32 %v1244_v56, 16  ;;  %v2141_v0 = vcombine.low %v1145_v54, %v1146_v1  ;;  %v1268_v26 = vcombine.high %v1267_v61, %v1267_v61  ;;  %v1122_v5 = vrot.slane %v1120_v62, 7  ;;  %2205 = vmatpush3.msra.mxu1 %v1941_v23  ;;  %v1927_v45 = vld [vmem:[#allocation13] sm:$0xff] }
 0x16e   :  { %v1337_v27 = vsel %vm2611_vm2, %v1298_v63, %v1336_v59  ;;  %v1129_v6 = vrot.slane %v1127_v49, 7  ;;  %v1130_v7 = vshll.u32 %v2184_v52, 16  ;;  %v1259_v46 = vrot.slane %v1252_v3, %v2618_v40  ;;  %2206 = vmatprep.subr.mxu1 %v2522_v21  ;;  %v1645_v52 = vld [vmem:[%s2975_s6] sm:$0x3] }
 0x16f   :  { %v1340_v8 = vsel %vm2611_vm2, %v1303_v58, %v1339_v57  ;;  %1338 = vst [vmem:[#allocation3 + $0x4] sm:$0x1] %v1337_v27  ;;  %1625 = vmatmul.mubr.bf16.gmra.mxu0 %v2141_v0  ;;  %v1275_v9 = vrot.slane %v1268_v26, %v2618_v40  ;;  %v1125_v47 = vor.u32 %v1123_v2, %v1122_v5  ;;  %v1725_v43 = vmul.u32 2, %v2615_v34  ;;  %v1673_v59 = vld [vmem:[%s2976_s7] sm:$0x3] }
 0x170   :  { %1341 = vst [vmem:[#allocation3 + $0x5] sm:$0x1] %v1340_v8  ;;  %1634 = vmatprep.mubr.bf16.mxu0 %v1048_v55  ;;  %v1132_v12 = vor.u32 %v1130_v7, %v1129_v6  ;;  %v1260_v13 = vcombine.high %v1259_v46, %v1259_v46  ;;  %2207 = vmatpush3.msra.mxu1 %v1940_v24 }
 0x171   :  { %v1276_v14 = vcombine.high %v1275_v9, %v1275_v9  ;;  %v1147_v16 = vsel %vm2611_vm2, %v1075_v4, %v1125_v47  ;;  %2208 = vmatprep.subr.mxu1 %v2522_v21  ;;  %v2877_v53 = vrot.slane %v1645_v52, %v2766_v38  ;;  %v2880_v54 = vrot.slane %v1645_v52, %v2760_v36 }
 0x172   :  { %v1148_v10 = vsel %vm2611_vm2, %v1076_v11, %v1132_v12  ;;  %v1308_v17 = vshrl.u32 %v1260_v13, 16  ;;  %2209 = vmatpush3.msra.mxu1 %v1939_v25  ;;  %v2175_v55 = vadd.s32 4294967293, %v1725_v43  ;;  %v2888_v61 = vrot.slane %v1673_v59, %v2766_v38 }
 0x173   :  { %v1313_v18 = vshrl.u32 %v1276_v14, 16  ;;  %v2142_v20 = vcombine.low %v1147_v16, %v1148_v10  ;;  %2210 = vmatprep.subr.mxu1 %v2522_v21  ;;  %v2893_v57 = vrot.slane %v1673_v59, %v2760_v36 }
 0x174   :  { %v1343_v40 = vsel %vm2611_vm2, %v1308_v17, %v1342_v51  ;;  %2211 = vmatpush3.msra.mxu1 %v1938_v28  ;;  %v1730_v1 = vadd.s32 1, %v2175_v55  ;;  %vm1727_vm6 = vcmp.ge.s32.totalorder %v2175_v55, 0  ;;  %vm1728_vm7 = vcmp.lt.s32.totalorder %v2175_v55, 5 }
 0x175   :  { %v1346_v19 = vsel %vm2611_vm2, %v1313_v18, %v1345_v15  ;;  %1344 = vst [vmem:[#allocation3 + $0x6] sm:$0x1] %v1343_v40  ;;  %2212 = vmatprep.subr.mxu1 %v2522_v21  ;;  %vm2908_vm9 = vmand %vm1727_vm6, %vm1728_vm7 }
 0x176   :  { %1347 = vst [vmem:[#allocation3 + $0x7] sm:$0x1] %v1346_v19  ;;  %2213 = vmatpush3.msra.mxu1 %v1937_v32  ;;  %vm1731_vm4 = vcmp.ge.s32.totalorder %v1730_v1, 0  ;;  %vm1732_vm5 = vcmp.lt.s32.totalorder %v1730_v1, 5 }
 0x177   :  { %1635 = vmatmul.mubr.bf16.gmra.mxu0 %v2142_v20  ;;  %2214 = vmatprep.subr.mxu1 %v2522_v21  ;;  %vm2902_vm8 = vmand %vm1731_vm4, %vm1732_vm5 }
 0x178   :  { %2215 = vmatpush3.msra.mxu1 %v1936_v29 }
 0x179   :  { %2216 = vmatprep.subr.mxu1 %v2522_v21 }
 0x17a   :  { %2217 = vmatpush3.msra.mxu1 %v1935_v30 }
 0x17b   :  { %2218 = vmatprep.subr.mxu1 %v2522_v21 }
 0x17c   :  { %2219 = vmatpush3.msra.mxu1 %v1934_v31 }
 0x17d   :  { %2220 = vmatprep.subr.mxu1 %v2522_v21 }
 0x17e   :  { %2221 = vmatpush3.msra.mxu1 %v1933_v33 }
 0x17f   :  { %2222 = vmatprep.subr.mxu1 %v2522_v21 }
 0x180   :  { %2223 = vmatpush3.msra.mxu1 %v1932_v35 }
 0x181   :  { %2224 = vmatprep.subr.mxu1 %v2522_v21 }
 0x182   :  { %2225 = vmatpush3.msra.mxu1 %v1931_v37 }
 0x183   :  { %2226 = vmatprep.subr.mxu1 %v2522_v21 }
 0x184   :  { %2227 = vmatpush3.msra.mxu1 %v1930_v41 }
 0x185   :  { %2228 = vmatprep.subr.mxu1 %v2522_v21 }
 0x186   :  { %2229 = vmatpush3.msra.mxu1 %v1929_v42 }
 0x187   :  { %2230 = vmatprep.subr.mxu1 %v2522_v21 }
 0x188   :  { %2231 = vmatpush3.msra.mxu1 %v1928_v39 }
 0x189   :  { %2232 = vmatprep.subr.mxu1 %v2522_v21 }
 0x18a   :  { %2233 = vmatpush3.msra.mxu1 %v1927_v45 }
 0x21b   :  { %v1606_v48 = vpop.f32.mrf.mxu0 }
 0x21c   :  { %v1657_v63 = vmul.f32 %v2880_v54, %v1606_v48 }
 0x21d   :  { %v1608_v44 = vpop.f32.mrf.mxu0 }
 0x21e   :  { %v1658_v60 = vmul.f32 %v2877_v53, %v1608_v44  ;;  %v1685_v38 = vadd.f32 %v2893_v57, %v1657_v63 }
 0x21f   :  { %v1610_v50 = vpop.f32.mrf.mxu0 }
 0x220   :  { %v1659_v62 = vmul.f32 %v2880_v54, %v1610_v50  ;;  %v1686_v49 = vadd.f32 %v2888_v61, %v1658_v60  ;;  %v1701_v11 = vmax.f32 %v1685_v38, 0.0 }
 0x221   :  { %v1612_v56 = vpop.f32.mrf.mxu0 }
 0x222   :  { %v1660_v34 = vmul.f32 %v2877_v53, %v1612_v56  ;;  %v1687_v58 = vadd.f32 %v2893_v57, %v1659_v62  ;;  %v1702_v6 = vmax.f32 %v1686_v49, 0.0  ;;  %v1737_v22 = vsel %vm2908_vm9, %v1701_v11, 0.0 }
 0x224   :  { %v1688_v2 = vadd.f32 %v2888_v61, %v1660_v34  ;;  %v1703_v7 = vmax.f32 %v1687_v58, 0.0  ;;  %v1747_v10 = vsel %vm2902_vm8, %v1702_v6, 0.0 }
 0x225   :  { %v1755_v31 = vadd.f32 %v1747_v10, %v1737_v22 }
 0x226   :  { %v1704_v27 = vmax.f32 %v1688_v2, 0.0  ;;  %v1738_v17 = vsel %vm2908_vm9, %v1703_v7, 0.0 }
 0x227   :  { %v1616_v0 = vpop.f32.mrf.mxu0  ;;  %v1763_v56 = vrot.slane %v1755_v31, 4 }
 0x228   :  { %v1661_v3 = vmul.f32 %v2880_v54, %v1616_v0  ;;  %v1748_v14 = vsel %vm2902_vm8, %v1704_v27, 0.0 }
 0x229   :  { %v1618_v26 = vpop.f32.mrf.mxu0  ;;  %v1756_v23 = vadd.f32 %v1748_v14, %v1738_v17 }
 0x22a   :  { %v1689_v5 = vadd.f32 %v2893_v57, %v1661_v3  ;;  %v1662_v36 = vmul.f32 %v2877_v53, %v1618_v26 }
 0x22b   :  { %v1620_v8 = vpop.f32.mrf.mxu0  ;;  %v1769_v45 = vrot.slane %v1756_v23, 4 }
 0x22c   :  { %v1690_v9 = vadd.f32 %v2888_v61, %v1662_v36  ;;  %v1663_v4 = vmul.f32 %v2880_v54, %v1620_v8  ;;  %v1705_v47 = vmax.f32 %v1689_v5, 0.0  ;;  %v1764_v5 = vadd.f32 %v1763_v56, %v1755_v31 }
 0x22d   :  { %v1622_v12 = vpop.f32.mrf.mxu0  ;;  %v1770_v49 = vadd.f32 %v1769_v45, %v1756_v23 }
 0x22e   :  { %v1706_v51 = vmax.f32 %v1690_v9, 0.0  ;;  %v1691_v15 = vadd.f32 %v2893_v57, %v1663_v4  ;;  %v1664_v16 = vmul.f32 %v2877_v53, %v1622_v12  ;;  %v1739_v24 = vsel %vm2908_vm9, %v1705_v47, 0.0 }
 0x22f   :  { %v1626_v18 = vpop.f32.mrf.mxu0  ;;  %v1771_v12 = vrot.slane %v1770_v49, 2 }
 0x230   :  { %v1749_v20 = vsel %vm2902_vm8, %v1706_v51, 0.0  ;;  %v1707_v40 = vmax.f32 %v1691_v15, 0.0  ;;  %v1692_v19 = vadd.f32 %v2888_v61, %v1664_v16  ;;  %v1665_v21 = vmul.f32 %v2880_v54, %v1626_v18 }
 0x231   :  { %v1628_v25 = vpop.f32.mrf.mxu0  ;;  %v1757_v28 = vadd.f32 %v1749_v20, %v1739_v24  ;;  %v1765_v20 = vrot.slane %v1764_v5, 2 }
 0x232   :  { %v1708_v32 = vmax.f32 %v1692_v19, 0.0  ;;  %v1693_v29 = vadd.f32 %v2893_v57, %v1665_v21  ;;  %v1666_v30 = vmul.f32 %v2877_v53, %v1628_v25  ;;  %v1740_v33 = vsel %vm2908_vm9, %v1707_v40, 0.0 }
 0x233   :  { %v1630_v35 = vpop.f32.mrf.mxu0  ;;  %v1775_v44 = vrot.slane %v1757_v28, 4  ;;  %v1772_v25 = vadd.f32 %v1771_v12, %v1770_v49 }
 0x234   :  { %v1750_v37 = vsel %vm2902_vm8, %v1708_v32, 0.0  ;;  %v1709_v41 = vmax.f32 %v1693_v29, 0.0  ;;  %v1694_v42 = vadd.f32 %v2888_v61, %v1666_v30  ;;  %v1667_v39 = vmul.f32 %v2880_v54, %v1630_v35 }
 0x235   :  { %v1758_v48 = vadd.f32 %v1750_v37, %v1740_v33  ;;  %v1632_v43 = vpop.f32.mrf.mxu0  ;;  %v1776_v3 = vadd.f32 %v1775_v44, %v1757_v28  ;;  %v1766_v30 = vadd.f32 %v1765_v20, %v1764_v5 }
 0x236   :  { %v1710_v52 = vmax.f32 %v1694_v42, 0.0  ;;  %v1695_v50 = vadd.f32 %v2893_v57, %v1667_v39  ;;  %v1668_v55 = vmul.f32 %v2877_v53, %v1632_v43  ;;  %v1741_v34 = vsel %vm2908_vm9, %v1709_v41, 0.0 }
 0x237   :  { %v1781_v59 = vrot.slane %v1758_v48, 4  ;;  %v1636_v60 = vpop.f32.mrf.mxu0  ;;  %v1777_v16 = vrot.slane %v1776_v3, 2  ;;  %v1773_v42 = vrot.slane %v1772_v25, 1  ;;  %v1767_v43 = vrot.slane %v1766_v30, 1 }
 0x238   :  { %v1751_v62 = vsel %vm2902_vm8, %v1710_v52, 0.0  ;;  %v1711_v63 = vmax.f32 %v1695_v50, 0.0  ;;  %v1696_v1 = vadd.f32 %v2888_v61, %v1668_v55  ;;  %v1669_v2 = vmul.f32 %v2880_v54, %v1636_v60 }
 0x239   :  { %v1759_v58 = vadd.f32 %v1751_v62, %v1741_v34  ;;  %v1638_v0 = vpop.f32.mrf.mxu0  ;;  %v1782_v36 = vadd.f32 %v1781_v59, %v1758_v48  ;;  %v1778_v29 = vadd.f32 %v1777_v16, %v1776_v3  ;;  %v1774_v56 = vadd.f32 %v1773_v42, %v1772_v25 }
 0x23a   :  { %v1712_v38 = vmax.f32 %v1696_v1, 0.0  ;;  %v1697_v26 = vadd.f32 %v2893_v57, %v1669_v2  ;;  %v1670_v27 = vmul.f32 %v2877_v53, %v1638_v0  ;;  %v1742_v7 = vsel %vm2908_vm9, %v1711_v63, 0.0 }
 0x23b   :  { %v1787_v6 = vrot.slane %v1759_v58, 4  ;;  %v1640_v8 = vpop.f32.mrf.mxu0  ;;  %v1783_v40 = vrot.slane %v1782_v36, 2  ;;  %v1779_v48 = vrot.slane %v1778_v29, 1  ;;  %v1768_v62 = vadd.f32 %v1767_v43, %v1766_v30 }
 0x23c   :  { %v1752_v9 = vsel %vm2902_vm8, %v1712_v38, 0.0  ;;  %v1713_v4 = vmax.f32 %v1697_v26, 0.0  ;;  %v1698_v11 = vadd.f32 %v2888_v61, %v1670_v27  ;;  %v1671_v47 = vmul.f32 %v2880_v54, %v1640_v8 }
 0x23d   :  { %v1788_v14 = vadd.f32 %v1787_v6, %v1759_v58  ;;  %v1760_v51 = vadd.f32 %v1752_v9, %v1742_v7  ;;  %v1642_v15 = vpop.f32.mrf.mxu0  ;;  %v1780_v13 = vadd.f32 %v1779_v48, %v1778_v29  ;;  %v1820_v49 = vsel %vm1819_vm10, %v1774_v56, %v1768_v62 }
 0x23e   :  { %v1714_v10 = vmax.f32 %v1698_v11, 0.0  ;;  %v1699_v17 = vadd.f32 %v2893_v57, %v1671_v47  ;;  %v1672_v18 = vmul.f32 %v2877_v53, %v1642_v15  ;;  %v1743_v21 = vsel %vm2908_vm9, %v1713_v4, 0.0  ;;  %v2176_v4 = vld [vmem:[%s2978_s9] ss:$0 sm:$0xff] }
 0x23f   :  { %v1793_v19 = vrot.slane %v1760_v51, 4  ;;  %v1789_v22 = vrot.slane %v1788_v14, 2  ;;  %v1784_v53 = vadd.f32 %v1783_v40, %v1782_v36  ;;  %v1822_v3 = vsel %vm1821_vm11, %v1780_v13, %v1820_v49 }
 0x240   :  { %v1753_v54 = vsel %vm2902_vm8, %v1714_v10, 0.0  ;;  %v1715_v23 = vmax.f32 %v1699_v17, 0.0  ;;  %v1700_v24 = vadd.f32 %v2888_v61, %v1672_v18 }
 0x241   :  { %v1794_v28 = vadd.f32 %v1793_v19, %v1760_v51  ;;  %v1761_v32 = vadd.f32 %v1753_v54, %v1743_v21  ;;  %v1790_v35 = vadd.f32 %v1789_v22, %v1788_v14  ;;  %v1785_v44 = vrot.slane %v1784_v53, 1 }
 0x242   :  { %v1716_v57 = vmax.f32 %v1700_v24, 0.0  ;;  %v1744_v37 = vsel %vm2908_vm9, %v1715_v23, 0.0 }
 0x243   :  { %v1795_v31 = vrot.slane %v1794_v28, 2  ;;  %v1799_v33 = vrot.slane %v1761_v32, 4  ;;  %v1791_v55 = vrot.slane %v1790_v35, 1  ;;  %v1786_v46 = vadd.f32 %v1785_v44, %v1784_v53 }
 0x244   :  { %v1754_v41 = vsel %vm2902_vm8, %v1716_v57, 0.0 }
 0x245   :  { %v1796_v39 = vadd.f32 %v1795_v31, %v1794_v28  ;;  %v1800_v45 = vadd.f32 %v1799_v33, %v1761_v32  ;;  %v1762_v61 = vadd.f32 %v1754_v41, %v1744_v37  ;;  %v1792_v2 = vadd.f32 %v1791_v55, %v1790_v35 }
 0x246   :  { %v1824_v26 = vsel %vm1823_vm12, %v1786_v46, %v1822_v3 }
 0x247   :  { %v1801_v52 = vrot.slane %v1800_v45, 2  ;;  %v1805_v50 = vrot.slane %v1762_v61, 4  ;;  %v1797_v59 = vrot.slane %v1796_v39, 1  ;;  %v1826_v5 = vsel %vm1825_vm13, %v1792_v2, %v1824_v26 }
 0x249   :  { %v1802_v34 = vadd.f32 %v1801_v52, %v1800_v45  ;;  %v1806_v60 = vadd.f32 %v1805_v50, %v1762_v61  ;;  %v1798_v58 = vadd.f32 %v1797_v59, %v1796_v39 }
 0x24b   :  { %v1803_v63 = vrot.slane %v1802_v34, 1  ;;  %v1807_v1 = vrot.slane %v1806_v60, 2  ;;  %v1828_v36 = vsel %vm1827_vm14, %v1798_v58, %v1826_v5 }
 0x24d   :  { %v1808_v0 = vadd.f32 %v1807_v1, %v1806_v60  ;;  %v1804_v38 = vadd.f32 %v1803_v63, %v1802_v34 }
 0x24f   :  { %v1809_v27 = vrot.slane %v1808_v0, 1  ;;  %v1830_v7 = vsel %vm1829_vm15, %v1804_v38, %v1828_v36 }
 0x251   :  { %v1810_v6 = vadd.f32 %v1809_v27, %v1808_v0 }
 0x253   :  { %v1832_v8 = vsel %vm1831_vm0, %v1810_v6, %v1830_v7 }
 0x254   :  { %v1926_v9 = vmul.f32 0.2, %v1832_v8 }
 0x256   :  { %2235 = vmatmul.mubr.f32.vlgmr.msra.gmra.mxu1 %v1926_v9 }
 0x316   :  { %v2016_v11 = vpop.f32.mrf.mxu1 }
 0x317   :  { %v2017_v47 = vadd.f32 %v2176_v4, %v2016_v11 }
 0x318   :  { %v2236_v12 = vpop.f32.mrf.mxu1 }
 0x319   :  { %v2020_v14 = vmax.f32 %v2017_v47, 0.0 }
 0x31b   :  { %2021 = vst [vmem:[#allocation14] sm:$0xff] %v2020_v14 }
 0x31c   :  { %2496 = shalt.err (!%p2493_p1)
}
 0x31d   :  { %2031 = dma.vmem_to_hbm [thread:$0]  %s2029_s22, 128, %s2979_s10, [#allocation7]  }
 0x31e   :  { %2511 = dma.done.wait [#allocation7], 128  }
 0x31f   :  { %2512 = vsyncadd [#allocation7], 4294967168 }
 0x320   :  { %2035 = vsyncpa [#allocation6], 1 }
 0x321   :  { %2036 = vsyncpa [#allocation9], 1 }
 0x322   :  { %2037 = vsyncpa [#allocation12], 1 }
 0x323   :  { %2038 = vsyncpa [#allocation7], 1 }

</bundles_post_ra>
